<compile_context>
chip_gen: v6e
topology: v6e:2x2x1
jax: 0.10.0
libtpu: 0.0.40
codegen_flags: <defaults>
</compile_context>

<pallas_src>
import functools

import jax
import jax.numpy as jnp
from jax.experimental import pallas as pl
from jax.experimental.pallas import tpu as pltpu


_MIB = 1024 * 1024
_DEFAULT_VMEM_BYTES = 64 * _MIB   # v7x floor; v5e/v6e have 128 MiB


def _round_up(x, m):
    return (x + m - 1) // m * m


def _tpu_vmem_capacity_bytes():
    """Physical VMEM per TensorCore, with a conservative (v7x) fallback."""
    try:
        info = pltpu.get_tpu_info()
        for name in ("vmem_capacity_bytes", "vmem_bytes", "vmem_size_bytes"):
            v = getattr(info, name, None)
            if isinstance(v, int) and v > 0:
                return v
    except Exception:
        pass
    return _DEFAULT_VMEM_BYTES


def _tpu_num_tensorcores():
    """TensorCores per chip (2 on v7x, 1 on v5e/v6e); conservative fallback 1."""
    try:
        info = pltpu.get_tpu_info()
        for name in ("num_cores", "core_count", "num_tensorcores",
                     "tensorcore_count"):
            v = getattr(info, name, None)
            if isinstance(v, int) and v > 0:
                return v
    except Exception:
        pass
    return 1


def _vmem_bytes_per_row(c, itemsize):
    # Double-buffered [tile_n, C] logits block: the minor dim is lane-padded to
    # 128 in VMEM, so it costs round_up(C,128)*itemsize per row regardless of C.
    per_row = 2 * _round_up(c, 128) * itemsize
    per_row += 2 * 4          # double-buffered int32 target block
    per_row += 2 * 4          # resident f32 lane-wide accumulator (+slack)
    return per_row


def _vmem_interm_bytes(c, chunk):
    # Live f32 intermediates are bounded by the inner chunk size, not tile_n:
    # ~a dozen (C, chunk) f32 temporaries plus the cast/transposed copies of the
    # (chunk, C) slice (lane-padded).
    return 12 * _round_up(c, 8) * chunk * 4 + 2 * _round_up(c, 128) * chunk * 4


def _focal_loss_kernel(x_ref, t_ref, w_ref, a_ref, out_ref, *,
                       gamma, total_n, tile_n, chunk, steps_per_core):
    ci = pl.program_id(0)        # per-TensorCore batch slice ("parallel")
    i = pl.program_id(1)         # reduction step within the slice ("arbitrary")

    # The output block index is constant along the reduction axis, so out_ref is
    # resident in VMEM across it and doubles as the lane-wide f32 accumulator.
    @pl.when(i == 0)
    def _():
        out_ref[...] = jnp.zeros_like(out_ref)

    c = x_ref.shape[1]
    n_chunks = tile_n // chunk
    w_col = w_ref[...].astype(jnp.float32)                       # (C, 1)
    a_col = a_ref[...].astype(jnp.float32)                       # (C, 1)
    # loop-invariant iotas, hoisted out of the chunk loop
    cls_iota = jax.lax.broadcasted_iota(jnp.int32, (c, chunk), 0)
    col_iota = jax.lax.broadcasted_iota(jnp.int32, (1, chunk), 1)
    tile_base = (ci * steps_per_core + i) * tile_n               # logical row offset

    def run_chunks(mask_tail):
        def body(j, carry):
            off = pl.multiple_of(j * chunk, chunk)
            # Rows arrive straight from HBM in the natural [rows, classes]
            # layout (no wrapper transpose/pad pass).  The small per-chunk
            # transpose to the lane-dense [classes, rows] layout rides the
            # XLU/extended slots and overlaps the next block's DMA.
            x_nat = x_ref[pl.ds(off, chunk), :].astype(jnp.float32)   # (chunk, C)
            x = jnp.transpose(x_nat)                                   # (C, chunk)
            t = t_ref[:, pl.ds(off, chunk)]                            # (1, chunk)
            onehot = (cls_iota == t).astype(jnp.float32)               # (C, chunk)

            # numerically stable log-softmax gather:
            #   CE = weight[t] * (logsumexp(x) - x[t])
            m = jnp.max(x, axis=0, keepdims=True)                              # (1, chunk)
            lse = m + jnp.log(jnp.sum(jnp.exp(x - m), axis=0, keepdims=True))  # (1, chunk)
            x_t = jnp.sum(x * onehot, axis=0, keepdims=True)
            w_t = jnp.sum(w_col * onehot, axis=0, keepdims=True)
            a_t = jnp.sum(a_col * onehot, axis=0, keepdims=True)

            ce = w_t * (lse - x_t)          # F.cross_entropy(..., weight, 'none')
            pt = jnp.exp(-ce)
            # clamp: rounding can push (1 - pt) slightly negative -> NaN in pow
            one_minus_pt = jnp.maximum(1.0 - pt, 0.0)

            if gamma == 0.0:
                focal = ce
            elif float(gamma).is_integer() and gamma > 0:
                # integer gamma (e.g. 2): cheap VPU multiplies, no EUP pow
                focal = ce
                for _ in range(int(gamma)):
                    focal = focal * one_minus_pt
            else:
                focal = one_minus_pt ** gamma * ce

            loss = a_t * focal                                         # (1, chunk)

            if mask_tail:
                # only the (at most one) overrunning step of each slice pays this
                loss = jnp.where(tile_base + off + col_iota < total_n, loss, 0.0)

            out_ref[:, :, pl.ds(off, chunk)] += loss.reshape(1, 1, chunk)
            return carry

        jax.lax.fori_loop(0, n_chunks, body, 0)

    # Gate the tail-mask work off the interior (fully in-bounds) grid steps.
    overruns = tile_base + tile_n > total_n

    @pl.when(jnp.logical_not(overruns))
    def _():
        run_chunks(mask_tail=False)

    @pl.when(overruns)
    def _():
        run_chunks(mask_tail=True)


def focal_loss(logits, target, *, gamma=0.0, weight=None, alpha=None,
               size_average=True, tile_n=None, chunk=512, num_cores=None):
    """Pallas TPU focal loss.

    logits: [N, C] float32 or bfloat16 (natural row-major layout; no host-side
            transpose or pad is performed; bf16 halves HBM traffic).
    target: [N] integer class ids.
    """
    n, c = logits.shape
    assert size_average, "only size_average=True (mean reduction) is implemented"
    # TODO(synk): size_average=False (per-sample, unreduced loss output) would
    # need a per-row output block instead of the resident lane-wide accumulator.
    # TODO(synk): for vocab-scale C a second "arbitrary" class-chunk axis with an
    # online logsumexp would be needed; here the (chunk, C) slice fits in vregs.

    itemsize = jnp.dtype(logits.dtype).itemsize
    chunk = max(128, _round_up(int(chunk), 128))

    vmem_cap = _tpu_vmem_capacity_bytes()
    per_row = _vmem_bytes_per_row(c, itemsize)
    interm = _vmem_interm_bytes(c, chunk)

    if tile_n is None:
        # Size the tile so each grid step moves ~1-2 MB of logits (per-step
        # pipeline overhead ~0.35us), bounded by a generation-aware VMEM budget
        # that also accounts for the in-kernel intermediates.
        budget = min(int(vmem_cap * 0.55), 56 * _MIB)
        avail = max(budget - interm, chunk * per_row)
        tile_n = max(chunk, (avail // per_row) // chunk * chunk)
        tile_n = min(tile_n, 1 << 16, _round_up(n, chunk))
        tile_n = max(tile_n, chunk)
    else:
        tile_n = max(chunk, _round_up(int(tile_n), chunk))

    vmem_limit = tile_n * per_row + interm + 8 * _MIB
    vmem_limit = int(min(max(vmem_limit, 16 * _MIB), vmem_cap - 4 * _MIB))

    total_steps = -(-n // tile_n)
    n_cores = _tpu_num_tensorcores() if num_cores is None else int(num_cores)
    n_par = max(1, min(n_cores, total_steps))
    steps_per_core = -(-total_steps // n_par)
    last_block = total_steps - 1

    # No HBM transpose/pad of the logits; the target reshape is metadata-only.
    tgt = target.astype(jnp.int32).reshape(1, n)
    w = (jnp.ones((c, 1), jnp.float32) if weight is None
         else jnp.asarray(weight, jnp.float32).reshape(c, 1))
    a = (jnp.ones((c, 1), jnp.float32) if alpha is None
         else jnp.asarray(alpha, jnp.float32).reshape(c, 1))

    kernel = functools.partial(
        _focal_loss_kernel, gamma=float(gamma), total_n=n, tile_n=tile_n,
        chunk=chunk, steps_per_core=steps_per_core)

    # Padded trailing steps (from the per-core split) are clamped to the last
    # valid block; their contribution is zeroed by the in-kernel tail mask.
    def x_map(ci_, i_):
        return (jnp.minimum(ci_ * steps_per_core + i_, last_block), 0)

    def t_map(ci_, i_):
        return (0, jnp.minimum(ci_ * steps_per_core + i_, last_block))

    cost = pl.CostEstimate(
        flops=int(n * (8 * c + 24)),
        transcendentals=int(n * (c + 4)),
        bytes_accessed=int(n * c * itemsize + n * 4 + n_par * tile_n * 4 + 8 * c))

    partial_sums = pl.pallas_call(
        kernel,
        out_shape=jax.ShapeDtypeStruct((n_par, 1, tile_n), jnp.float32),
        grid_spec=pltpu.PrefetchScalarGridSpec(
            num_scalar_prefetch=0,
            grid=(n_par, steps_per_core),
            in_specs=[
                pl.BlockSpec((tile_n, c), x_map),              # logits, natural layout
                pl.BlockSpec((1, tile_n), t_map),              # targets, lane-dense
                pl.BlockSpec((c, 1), lambda ci_, i_: (0, 0)),  # class weight (resident)
                pl.BlockSpec((c, 1), lambda ci_, i_: (0, 0)),  # alpha (resident)
            ],
            # one lane-dense accumulator block per parallel slice
            out_specs=pl.BlockSpec((1, 1, tile_n), lambda ci_, i_: (ci_, 0, 0)),
        ),
        compiler_params=pltpu.CompilerParams(
            dimension_semantics=("parallel", "arbitrary"),
            vmem_limit_bytes=vmem_limit),
        cost_estimate=cost,
    )(logits, tgt, w, a)

    # tiny final reduction + mean outside the kernel
    return jnp.sum(partial_sums) / n


def _focal_loss_ref(logits, target, *, gamma, weight, alpha):
    x = logits.astype(jnp.float32)
    lse = jax.nn.logsumexp(x, axis=-1)
    nll = lse - jnp.take_along_axis(x, target[:, None], axis=-1)[:, 0]
    w = jnp.ones(x.shape[1]) if weight is None else jnp.asarray(weight, jnp.float32)
    ce = w[target] * nll
    pt = jnp.exp(-ce)
    loss = (1.0 - pt) ** gamma * ce
    if alpha is not None:
        loss = jnp.asarray(alpha, jnp.float32)[target] * loss
    return jnp.mean(loss)


if __name__ == "__main__":
    key = jax.random.PRNGKey(0)
    k1, k2 = jax.random.split(key)

    N, C = 2500, 10
    weight = [1.0 + 0.1 * i for i in range(C)]     # deterministic class weights
    alpha = [0.5 + 0.05 * i for i in range(C)]     # deterministic alpha terms

    logits = jax.random.normal(k1, (N, C), dtype=jnp.float32)
    target = jax.random.randint(k2, (N,), 0, C, dtype=jnp.int32)

    # Small explicit tile so the demo exercises the multi-step reduction axis,
    # the two-slice "parallel" axis, the clamped padded step and tail masking.
    loss = focal_loss(logits, target, gamma=2.0, weight=weight, alpha=alpha,
                      size_average=True, tile_n=1024, num_cores=2)
    loss = jax.block_until_ready(loss)
    ref = _focal_loss_ref(logits, target, gamma=2.0, weight=weight, alpha=alpha)
    assert jnp.allclose(loss, ref, rtol=1e-4, atol=1e-5), (loss, ref)

    # Auto-sized tile, detected core count, non-integer gamma, default weight/alpha.
    loss2 = focal_loss(logits, target, gamma=1.5)
    loss2 = jax.block_until_ready(loss2)
    ref2 = _focal_loss_ref(logits, target, gamma=1.5, weight=None, alpha=None)
    assert jnp.allclose(loss2, ref2, rtol=1e-4, atol=1e-5), (loss2, ref2)

    # bf16 logits path (halves HBM traffic; kernel still computes in f32).
    logits_bf16 = logits.astype(jnp.bfloat16)
    loss3 = focal_loss(logits_bf16, target, gamma=2.0, weight=weight, alpha=alpha)
    loss3 = jax.block_until_ready(loss3)
    ref3 = _focal_loss_ref(logits_bf16.astype(jnp.float32), target, gamma=2.0,
                           weight=weight, alpha=alpha)
    assert jnp.allclose(loss3, ref3, rtol=1e-3, atol=1e-4), (loss3, ref3)

    print("KERNEL_OK")
</pallas_src>

<mosaic_0001>
module attributes {stable_mosaic.version = 11 : i64} {
  func.func @_focal_loss_kernel(%arg0: i32, %arg1: i32, %arg2: memref<1024x10xf32, #tpu.memory_space<vmem>>, %arg3: memref<1x1024xi32, #tpu.memory_space<vmem>>, %arg4: memref<10x1xf32, #tpu.memory_space<vmem>>, %arg5: memref<10x1xf32, #tpu.memory_space<vmem>>, %arg6: memref<1x1x1024xf32, #tpu.memory_space<vmem>>) attributes {dimension_semantics = [#tpu.dimension_semantics<parallel>, #tpu.dimension_semantics<arbitrary>], iteration_bounds = array<i64: 2, 2>, scalar_prefetch = 0 : i64, scratch_operands = 0 : i64, tpu.core_type = #tpu.core_type<tc>, window_params = [{transform_indices = @transform_0, window_bounds = array<i64: 1024, 10>}, {transform_indices = @transform_1, window_bounds = array<i64: 1, 1024>}, {pipeline_mode = #tpu.pipeline_mode<synchronous>, transform_indices = @transform_2, window_bounds = array<i64: 10, 1>}, {pipeline_mode = #tpu.pipeline_mode<synchronous>, transform_indices = @transform_3, window_bounds = array<i64: 10, 1>}, {transform_indices = @transform_4, window_bounds = array<i64: 1, 1, 1024>}]} {
    %c0_i32 = arith.constant 0 : i32
    %0 = arith.cmpi eq, %arg1, %c0_i32 : i32
    %1 = arith.extui %0 : i1 to i32
    %c0_i32_0 = arith.constant 0 : i32
    %2 = arith.cmpi ne, %1, %c0_i32_0 : i32
    scf.if %2 {
      %cst = arith.constant 0.000000e+00 : f32
      %17 = vector.broadcast %cst : f32 to vector<1x1x1024xf32>
      %c0_7 = arith.constant 0 : index
      %c0_8 = arith.constant 0 : index
      %c0_9 = arith.constant 0 : index
      %18 = vector.load %arg6[%c0_7, %c0_8, %c0_9] : memref<1x1x1024xf32, #tpu.memory_space<vmem>>, vector<1x1x1024xf32>
      tpu.vector_store %arg6[%c0_7, %c0_8, %c0_9], %17 {strides = array<i32>} : memref<1x1x1024xf32, #tpu.memory_space<vmem>>, vector<1x1x1024xf32>,
    } else {
    }
    %c0 = arith.constant 0 : index
    %c0_1 = arith.constant 0 : index
    %3 = vector.load %arg4[%c0, %c0_1] : memref<10x1xf32, #tpu.memory_space<vmem>>, vector<10x1xf32>
    %c0_2 = arith.constant 0 : index
    %c0_3 = arith.constant 0 : index
    %4 = vector.load %arg5[%c0_2, %c0_3] : memref<10x1xf32, #tpu.memory_space<vmem>>, vector<10x1xf32>
    %5 = tpu.iota {dimensions = array<i32: 0>} : vector<10x512xi32>
    %6 = tpu.iota {dimensions = array<i32: 1>} : vector<1x512xi32>
    %c2_i32 = arith.constant 2 : i32
    %7 = arith.muli %arg0, %c2_i32 : i32
    %8 = arith.addi %7, %arg1 : i32
    %c1024_i32 = arith.constant 1024 : i32
    %9 = arith.muli %8, %c1024_i32 : i32
    %c1024_i32_4 = arith.constant 1024 : i32
    %10 = arith.addi %9, %c1024_i32_4 : i32
    %c2500_i32 = arith.constant 2500 : i32
    %11 = arith.cmpi sgt, %10, %c2500_i32 : i32
    %true = arith.constant true
    %12 = arith.xori %11, %true : i1
    %13 = arith.extui %12 : i1 to i32
    %c0_i32_5 = arith.constant 0 : i32
    %14 = arith.cmpi ne, %13, %c0_i32_5 : i32
    scf.if %14 {
      %c0_i32_7 = arith.constant 0 : i32
      %c2_i32_8 = arith.constant 2 : i32
      %17 = arith.addi %c0_i32_7, %c2_i32_8 : i32
      %c1_i32 = arith.constant 1 : i32
      scf.for %arg7 = %c0_i32_7 to %17 step %c1_i32  : i32 {
        %c512_i32 = arith.constant 512 : i32
        %18 = arith.muli %arg7, %c512_i32 : i32
        %19 = tpu.assume_multiple %18, 512 : i32
        %20 = arith.index_cast %19 : i32 to index
        %c0_10 = arith.constant 0 : index
        %21 = vector.load %arg2[%20, %c0_10] : memref<1024x10xf32, #tpu.memory_space<vmem>>, vector<512x10xf32>
        %22 = tpu.transpose %21, [1, 0] : vector<512x10xf32> -> vector<10x512xf32>
        %c0_11 = arith.constant 0 : index
        %23 = arith.index_cast %19 : i32 to index
        %24 = vector.load %arg3[%c0_11, %23] : memref<1x1024xi32, #tpu.memory_space<vmem>>, vector<1x512xi32>
        %25 = vector.broadcast %24 : vector<1x512xi32> to vector<10x512xi32>
        %26 = arith.cmpi eq, %5, %25 : vector<10x512xi32>
        %27 = arith.extui %26 : vector<10x512xi1> to vector<10x512xi32>
        %28 = arith.sitofp %27 : vector<10x512xi32> to vector<10x512xf32>
        %cst = arith.constant dense<0xFF800000> : vector<512xf32>
        %29 = vector.multi_reduction <maximumf>, %22, %cst [0] : vector<10x512xf32> to vector<512xf32>
        %30 = vector.shape_cast %29 : vector<512xf32> to vector<1x512xf32>
        %31 = vector.broadcast %30 : vector<1x512xf32> to vector<10x512xf32>
        %32 = arith.subf %22, %31 : vector<10x512xf32>
        %33 = math.exp %32 : vector<10x512xf32>
        %cst_12 = arith.constant dense<0.000000e+00> : vector<512xf32>
        %34 = vector.multi_reduction <add>, %33, %cst_12 [0] : vector<10x512xf32> to vector<512xf32>
        %35 = vector.shape_cast %34 : vector<512xf32> to vector<1x512xf32>
        %36 = math.log %35 : vector<1x512xf32>
        %37 = arith.addf %30, %36 : vector<1x512xf32>
        %38 = arith.mulf %22, %28 : vector<10x512xf32>
        %cst_13 = arith.constant dense<0.000000e+00> : vector<512xf32>
        %39 = vector.multi_reduction <add>, %38, %cst_13 [0] : vector<10x512xf32> to vector<512xf32>
        %40 = vector.shape_cast %39 : vector<512xf32> to vector<1x512xf32>
        %41 = vector.broadcast %3 : vector<10x1xf32> to vector<10x512xf32>
        %42 = arith.mulf %41, %28 : vector<10x512xf32>
        %cst_14 = arith.constant dense<0.000000e+00> : vector<512xf32>
        %43 = vector.multi_reduction <add>, %42, %cst_14 [0] : vector<10x512xf32> to vector<512xf32>
        %44 = vector.shape_cast %43 : vector<512xf32> to vector<1x512xf32>
        %45 = vector.broadcast %4 : vector<10x1xf32> to vector<10x512xf32>
        %46 = arith.mulf %45, %28 : vector<10x512xf32>
        %cst_15 = arith.constant dense<0.000000e+00> : vector<512xf32>
        %47 = vector.multi_reduction <add>, %46, %cst_15 [0] : vector<10x512xf32> to vector<512xf32>
        %48 = vector.shape_cast %47 : vector<512xf32> to vector<1x512xf32>
        %49 = arith.subf %37, %40 : vector<1x512xf32>
        %50 = arith.mulf %44, %49 : vector<1x512xf32>
        %cst_16 = arith.constant 0.000000e+00 : f32
        %51 = vector.broadcast %cst_16 : f32 to vector<1x512xf32>
        %52 = arith.subf %51, %50 : vector<1x512xf32>
        %53 = math.exp %52 : vector<1x512xf32>
        %cst_17 = arith.constant 1.000000e+00 : f32
        %54 = vector.broadcast %cst_17 : f32 to vector<1x512xf32>
        %55 = arith.subf %54, %53 : vector<1x512xf32>
        %cst_18 = arith.constant 0.000000e+00 : f32
        %56 = vector.broadcast %cst_18 : f32 to vector<1x512xf32>
        %57 = arith.maximumf %55, %56 : vector<1x512xf32>
        %58 = arith.mulf %50, %57 : vector<1x512xf32>
        %59 = arith.mulf %58, %57 : vector<1x512xf32>
        %60 = arith.mulf %48, %59 : vector<1x512xf32>
        %c0_19 = arith.constant 0 : index
        %c0_20 = arith.constant 0 : index
        %61 = arith.index_cast %19 : i32 to index
        %62 = vector.load %arg6[%c0_19, %c0_20, %61] : memref<1x1x1024xf32, #tpu.memory_space<vmem>>, vector<1x1x512xf32>
        %63 = vector.shape_cast %60 : vector<1x512xf32> to vector<1x1x512xf32>
        %64 = arith.addf %62, %63 : vector<1x1x512xf32>
        %c0_21 = arith.constant 0 : index
        %c0_22 = arith.constant 0 : index
        %65 = arith.index_cast %19 : i32 to index
        %66 = vector.load %arg6[%c0_21, %c0_22, %65] : memref<1x1x1024xf32, #tpu.memory_space<vmem>>, vector<1x1x512xf32>
        tpu.vector_store %arg6[%c0_21, %c0_22, %65], %64 {strides = array<i32>} : memref<1x1x1024xf32, #tpu.memory_space<vmem>>, vector<1x1x512xf32>,
      }
      %c2_i32_9 = arith.constant 2 : i32
    } else {
    }
    %15 = arith.extui %11 : i1 to i32
    %c0_i32_6 = arith.constant 0 : i32
    %16 = arith.cmpi ne, %15, %c0_i32_6 : i32
    scf.if %16 {
      %c0_i32_7 = arith.constant 0 : i32
      %c2_i32_8 = arith.constant 2 : i32
      %17 = arith.addi %c0_i32_7, %c2_i32_8 : i32
      %c1_i32 = arith.constant 1 : i32
      scf.for %arg7 = %c0_i32_7 to %17 step %c1_i32  : i32 {
        %c512_i32 = arith.constant 512 : i32
        %18 = arith.muli %arg7, %c512_i32 : i32
        %19 = tpu.assume_multiple %18, 512 : i32
        %20 = arith.index_cast %19 : i32 to index
        %c0_10 = arith.constant 0 : index
        %21 = vector.load %arg2[%20, %c0_10] : memref<1024x10xf32, #tpu.memory_space<vmem>>, vector<512x10xf32>
        %22 = tpu.transpose %21, [1, 0] : vector<512x10xf32> -> vector<10x512xf32>
        %c0_11 = arith.constant 0 : index
        %23 = arith.index_cast %19 : i32 to index
        %24 = vector.load %arg3[%c0_11, %23] : memref<1x1024xi32, #tpu.memory_space<vmem>>, vector<1x512xi32>
        %25 = vector.broadcast %24 : vector<1x512xi32> to vector<10x512xi32>
        %26 = arith.cmpi eq, %5, %25 : vector<10x512xi32>
        %27 = arith.extui %26 : vector<10x512xi1> to vector<10x512xi32>
        %28 = arith.sitofp %27 : vector<10x512xi32> to vector<10x512xf32>
        %cst = arith.constant dense<0xFF800000> : vector<512xf32>
        %29 = vector.multi_reduction <maximumf>, %22, %cst [0] : vector<10x512xf32> to vector<512xf32>
        %30 = vector.shape_cast %29 : vector<512xf32> to vector<1x512xf32>
        %31 = vector.broadcast %30 : vector<1x512xf32> to vector<10x512xf32>
        %32 = arith.subf %22, %31 : vector<10x512xf32>
        %33 = math.exp %32 : vector<10x512xf32>
        %cst_12 = arith.constant dense<0.000000e+00> : vector<512xf32>
        %34 = vector.multi_reduction <add>, %33, %cst_12 [0] : vector<10x512xf32> to vector<512xf32>
        %35 = vector.shape_cast %34 : vector<512xf32> to vector<1x512xf32>
        %36 = math.log %35 : vector<1x512xf32>
        %37 = arith.addf %30, %36 : vector<1x512xf32>
        %38 = arith.mulf %22, %28 : vector<10x512xf32>
        %cst_13 = arith.constant dense<0.000000e+00> : vector<512xf32>
        %39 = vector.multi_reduction <add>, %38, %cst_13 [0] : vector<10x512xf32> to vector<512xf32>
        %40 = vector.shape_cast %39 : vector<512xf32> to vector<1x512xf32>
        %41 = vector.broadcast %3 : vector<10x1xf32> to vector<10x512xf32>
        %42 = arith.mulf %41, %28 : vector<10x512xf32>
        %cst_14 = arith.constant dense<0.000000e+00> : vector<512xf32>
        %43 = vector.multi_reduction <add>, %42, %cst_14 [0] : vector<10x512xf32> to vector<512xf32>
        %44 = vector.shape_cast %43 : vector<512xf32> to vector<1x512xf32>
        %45 = vector.broadcast %4 : vector<10x1xf32> to vector<10x512xf32>
        %46 = arith.mulf %45, %28 : vector<10x512xf32>
        %cst_15 = arith.constant dense<0.000000e+00> : vector<512xf32>
        %47 = vector.multi_reduction <add>, %46, %cst_15 [0] : vector<10x512xf32> to vector<512xf32>
        %48 = vector.shape_cast %47 : vector<512xf32> to vector<1x512xf32>
        %49 = arith.subf %37, %40 : vector<1x512xf32>
        %50 = arith.mulf %44, %49 : vector<1x512xf32>
        %cst_16 = arith.constant 0.000000e+00 : f32
        %51 = vector.broadcast %cst_16 : f32 to vector<1x512xf32>
        %52 = arith.subf %51, %50 : vector<1x512xf32>
        %53 = math.exp %52 : vector<1x512xf32>
        %cst_17 = arith.constant 1.000000e+00 : f32
        %54 = vector.broadcast %cst_17 : f32 to vector<1x512xf32>
        %55 = arith.subf %54, %53 : vector<1x512xf32>
        %cst_18 = arith.constant 0.000000e+00 : f32
        %56 = vector.broadcast %cst_18 : f32 to vector<1x512xf32>
        %57 = arith.maximumf %55, %56 : vector<1x512xf32>
        %58 = arith.mulf %50, %57 : vector<1x512xf32>
        %59 = arith.mulf %58, %57 : vector<1x512xf32>
        %60 = arith.mulf %48, %59 : vector<1x512xf32>
        %61 = arith.addi %9, %19 : i32
        %62 = vector.broadcast %61 : i32 to vector<1x512xi32>
        %63 = arith.addi %62, %6 : vector<1x512xi32>
        %c2500_i32_19 = arith.constant 2500 : i32
        %64 = vector.broadcast %c2500_i32_19 : i32 to vector<1x512xi32>
        %65 = arith.cmpi slt, %63, %64 : vector<1x512xi32>
        %cst_20 = arith.constant 0.000000e+00 : f32
        %66 = vector.broadcast %cst_20 : f32 to vector<1x512xf32>
        %67 = arith.select %65, %60, %66 : vector<1x512xi1>, vector<1x512xf32>
        %c0_21 = arith.constant 0 : index
        %c0_22 = arith.constant 0 : index
        %68 = arith.index_cast %19 : i32 to index
        %69 = vector.load %arg6[%c0_21, %c0_22, %68] : memref<1x1x1024xf32, #tpu.memory_space<vmem>>, vector<1x1x512xf32>
        %70 = vector.shape_cast %67 : vector<1x512xf32> to vector<1x1x512xf32>
        %71 = arith.addf %69, %70 : vector<1x1x512xf32>
        %c0_23 = arith.constant 0 : index
        %c0_24 = arith.constant 0 : index
        %72 = arith.index_cast %19 : i32 to index
        %73 = vector.load %arg6[%c0_23, %c0_24, %72] : memref<1x1x1024xf32, #tpu.memory_space<vmem>>, vector<1x1x512xf32>
        tpu.vector_store %arg6[%c0_23, %c0_24, %72], %71 {strides = array<i32>} : memref<1x1x1024xf32, #tpu.memory_space<vmem>>, vector<1x1x512xf32>,
      }
      %c2_i32_9 = arith.constant 2 : i32
    } else {
    }
    return
  }
  func.func @transform_0(%arg0: i32, %arg1: i32) -> (i32, i32) {
    %c2_i32 = arith.constant 2 : i32
    %0 = arith.muli %arg0, %c2_i32 : i32
    %1 = arith.addi %0, %arg1 : i32
    %c2_i32_0 = arith.constant 2 : i32
    %2 = arith.minsi %1, %c2_i32_0 : i32
    %c0_i32 = arith.constant 0 : i32
    %c0_i32_1 = arith.constant 0 : i32
    return %2, %c0_i32 : i32, i32
  }
  func.func @transform_1(%arg0: i32, %arg1: i32) -> (i32, i32) {
    %c2_i32 = arith.constant 2 : i32
    %0 = arith.muli %arg0, %c2_i32 : i32
    %1 = arith.addi %0, %arg1 : i32
    %c2_i32_0 = arith.constant 2 : i32
    %2 = arith.minsi %1, %c2_i32_0 : i32
    %c0_i32 = arith.constant 0 : i32
    %c0_i32_1 = arith.constant 0 : i32
    return %c0_i32, %2 : i32, i32
  }
  func.func @transform_2(%arg0: i32, %arg1: i32) -> (i32, i32) {
    %c0_i32 = arith.constant 0 : i32
    %c0_i32_0 = arith.constant 0 : i32
    %c0_i32_1 = arith.constant 0 : i32
    return %c0_i32, %c0_i32_0 : i32, i32
  }
  func.func @transform_3(%arg0: i32, %arg1: i32) -> (i32, i32) {
    %c0_i32 = arith.constant 0 : i32
    %c0_i32_0 = arith.constant 0 : i32
    %c0_i32_1 = arith.constant 0 : i32
    return %c0_i32, %c0_i32_0 : i32, i32
  }
  func.func @transform_4(%arg0: i32, %arg1: i32) -> (i32, i32, i32) {
    %c0_i32 = arith.constant 0 : i32
    %c0_i32_0 = arith.constant 0 : i32
    %c0_i32_1 = arith.constant 0 : i32
    return %arg0, %c0_i32, %c0_i32_0 : i32, i32, i32
  }
}

</mosaic_0001>

<bundles_post_ra>
// kernel: tpu_custom_call.1
= control target key start
LH: loop header
LB: loop body
LE: loop exit
PB: predicated region body
PF: predicated region fallthrough
CT: control target
= control target key end

     0   :  { %9 = vsyncpa [#allocation3], 0  ;;  %s2604_s0 = inlined_call_operand.vmem [shape: f32[2500,10], index: 0, kind: input, shape index: {}]   ;;  %s2605_s1 = inlined_call_operand.vmem [shape: s32[1,2500], index: 1, kind: input, shape index: {}]   ;;  %s2606_s2 = inlined_call_operand.vmem [shape: f32[10,1], index: 2, kind: input, shape index: {}]   ;;  %s2607_s3 = inlined_call_operand.vmem [shape: f32[10,1], index: 3, kind: input, shape index: {}]   ;;  %s2608_s4 = inlined_call_operand.hbm [shape: f32[2,1,1024], index: 4, kind: output, shape index: {}]  }
   0x1   :  { %11 = vsyncpa [#allocation3 + $0x1], 0  ;;  %s1953_s15 = smov 0   ;;  %s1955_s16 = smov 0  }
   0x2   :  { %s1957_s17 = smov 0   ;;  %s1959_s18 = smov 0  }
   0x3   :  { %s1961_s19 = smov 0   ;;  %s1963_s20 = smov 0  }
   0x4   :  { %s1965_s21 = smov 0   ;;  %s1967_s22 = smov 0  }
   0x5 LB: > { %s1604_s23 = sadd.s32 4294967295, %s1910_s22   ;;  %s1605_s24 = sadd.s32 4294967294, %s1910_s22   ;;  %s1910_s22 = sphi %s1967_s22, %s17_s22   ;;  %s1906_s21 = sphi %s1965_s21, %s2619_s21   ;;  %s1902_s20 = sphi %s1963_s20, %s2618_s20   ;;  %s1898_s19 = sphi %s1961_s19, %s2617_s19   ;;  %s1894_s18 = sphi %s1959_s18, %s2616_s18   ;;  %s1890_s17 = sphi %s1957_s17, %s2615_s17   ;;  %s1886_s16 = sphi %s1955_s16, %s2614_s16   ;;  %s1882_s15 = sphi %s1953_s15, %s2613_s15  }
   0x6   : > { %s26_s25 = sadd.s32 1, %s1902_s20  ;;  %s29_s26 = sadd.s32 1, %s1906_s21 }
   0x7   : > { %p27_p0 = scmp.ge.s32.totalorder %s26_s25, 2  ;;  %p156_p1 = scmp.ne.s32.totalorder %s1890_s17, %s1886_s16 }
   0x8   : > { %p157_p2 = scmp.eq.s32.totalorder %s1604_s23, 3  ;;  %p162_p4 = scmp.ne.s32.totalorder %s1886_s16, %s1882_s15 }
   0x9   : > { %s2621_s25 = smov (%p27_p0, %s26_s25), 0  ;;  %s2623_s26 = smov (!%p27_p0, %s29_s26), %s1906_s21 }
   0xa   : > { %p2002_p3 = por %p157_p2, %p156_p1  ;;  %p31_p5 = scmp.ge.s32.totalorder %s2623_s26, 2 }
   0xb   : > { %p163_p6 = scmp.eq.s32.totalorder %s1605_s24, 3  ;;  %p1612_p7 = scmp.ge.s32.totalorder %s1910_s22, 1 }
   0xc   : > { %p236_p8 = scmp.lt.s32.totalorder %s1910_s22, 5  ;;  %s2625_s26 = smov (%p31_p5, %s2623_s26), 0 }
   0xd   : > { %p2012_p9 = por %p163_p6, %p162_p4  ;;  %s143_s29 = ssub.s32 %s1906_s21, %s2625_s26 }
   0xe   : > { %p237_p10 = pnand %p1612_p7, %p236_p8  ;;  %s146_s30 = sadd.s32 1, %s1890_s17 }
   0xf   : > { %p144_p11 = scmp.eq.s32.totalorder %s143_s29, 0  ;;  %s2609_s6 = sand.u32 (!%p237_p10), 1, %s1886_s16  }
  0x10   : > { %240 = sbr.rel (%p237_p10) target bundleno = 783 (0x30f), region = 36  ;;  %s1614_s7 = sshll.u32 (!%p237_p10), %s1898_s19, 1 }
  0x11   : > { %s2020_s5 = scalar_select %p144_p11, %s1890_s17, %s146_s30  }
  0x12   : > { %s1613_s8 = sshll.u32 (!%p237_p10), %s2609_s6, 3  ;;  %s2027_s9 = sadd.s32 (!%p237_p10), %s1894_s18, %s1614_s7 }
  0x13   : > { %p284_p12 = scmp.lt.s32.totalorder (!%p237_p10), %s2027_s9, 2  ;;  %s2041_s6 = scalar_lea.vmem (!%p237_p10), [#allocation2], %s1613_s8 }
  0x14   : > { %p1619_p1 = scmp.ne.s32.totalorder (!%p237_p10), %s1894_s18, 0 }
  0x15   : > { %s285_s10 = scalar_select %p284_p12, %s2027_s9, 2 }
  0x17   : > { %s1615_s11 = sshll.u32 %s285_s10, 7  ;;  %s1618_s12 = sshll.u32 %s285_s10, 3 }
  0x18   : > { %p291_p13 = scmp.lt.s32.totalorder %s1615_s11, 312  ;;  %p313_p0 = scmp.lt.s32.totalorder %s1618_s12, 19 }
  0x19   : > { %328 = sbr.rel (%p1619_p1) target bundleno = 32 (0x20), region = 40 }
  0x1a   : > { %s2627_s11 = smov (!%p291_p13, %s1615_s11), 312  ;;  %s2629_s12 = smov (!%p313_p0, %s1618_s12), 19 }
  0x1b   : > { %s1616_s13 = sshll.u32 %s2627_s11, 3  ;;  %s2039_s7 = scalar_lea.vmem %s2605_s1, %s2629_s12 }
  0x1c   : > { %s2034_s24 = scalar_lea.vmem %s2604_s0, %s1616_s13 }
  0x1e   : > { %v1920_v0 = vmov 0.0  }
  0x1f   : > { %329 = vst [vmem:[%s2041_s6] sm:$0xff] %v1920_v0 }
  0x20 PF: > { %v2048_v1 = vld [vmem:[%s2606_s2] sm:$0xff]  ;;  %v2053_v2 = vld [vmem:[%s2606_s2 + $0x8] sm:$0x3]  ;;  %v334_v4 = vlaneseq  ;;  %s1621_s18 = sshll.u32 %s2027_s9, 10 }
  0x21   : > { %v2058_v3 = vld [vmem:[%s2607_s3] sm:$0xff]  ;;  %v2064_v5 = vld [vmem:[%s2607_s3 + $0x8] sm:$0x3]  ;;  %s2068_s30 = sadd.s32 1024, %s1621_s18 }
  0x22   : > { %v2071_v6 = vshrl.u32 %v334_v4, 7  ;;  %v2074_v7 = vand.u32 127, %v334_v4  ;;  %p1622_p2 = scmp.gt.s32.totalorder %s2068_s30, 2500 }
  0x23   : > { %s2089_s10 = smov (!%p1622_p2), 0  }
  0x24   : > { %v2077_v8 = vadd.s32 8, %v2071_v6  ;;  %v2080_v9 = vadd.s32 128, %v2074_v7  ;;  %v2083_v10 = vadd.s32 256, %v2074_v7  ;;  %v2086_v11 = vadd.s32 384, %v2074_v7  ;;  %350 = sbr.rel (%p1622_p2) target bundleno = 396 (0x18c), region = 44 }
  0x29 LB: >> { %s1623_s11 = sshll.u32 %s1914_s10, 9  ;;  %vm595_vm0 = vcmask 1041408   ;;  %vm910_vm9 = vcmp.lt.s32.totalorder %v334_v4, 512  ;;  %s356_s10 = sadd.s32 1, %s1914_s10   ;;  %s1914_s10 = sphi %s2089_s10, %s356_s10  }
  0x2a   : >> { %s2098_s13 = scalar_lea.vmem %s2034_s24, %s1623_s11  ;;  %s2222_s14 = sshra.s32 %s1623_s11, 7 }
  0x2b   : >> { %v375_v12 = vld [vmem:[%s2098_s13 + $0x80] sm:$0xff]  ;;  %v376_v14 = vld [vmem:[%s2098_s13 + $0x88] sm:$0xff]  ;;  %v377_v16 = vld [vmem:[%s2098_s13 + $0x90] sm:$0xff]  ;;  %s553_s8 = scalar_lea.vmem %s2039_s7, %s2222_s14  ;;  %s876_s12 = scalar_lea.vmem %s2041_s6, %s2222_s14 [#allocation2] }
  0x2c   : >> { %v359_v13 = vld [vmem:[%s2098_s13] sm:$0xff]  ;;  %455 = vxpose.xlu1.b32.start [1/16] (narrow) %v375_v12, 16  ;;  %v360_v15 = vld [vmem:[%s2098_s13 + $0x8] sm:$0xff]  ;;  %v361_v17 = vld [vmem:[%s2098_s13 + $0x10] sm:$0xff]  ;;  %p353_p4 = scmp.ge.s32.totalorder %s356_s10, 2  }
  0x2d   : >> { %423 = vxpose.xlu0.b32.start [1/16] (narrow) %v359_v13, 16  ;;  %v378_v18 = vld [vmem:[%s2098_s13 + $0x98] sm:$0xff]  ;;  %v379_v20 = vld [vmem:[%s2098_s13 + $0xa0] sm:$0xff]  ;;  %v380_v22 = vld [vmem:[%s2098_s13 + $0xa8] sm:$0xff] }
  0x2e   : >> { %v362_v19 = vld [vmem:[%s2098_s13 + $0x18] sm:$0xff]  ;;  %v363_v21 = vld [vmem:[%s2098_s13 + $0x20] sm:$0xff]  ;;  %v364_v23 = vld [vmem:[%s2098_s13 + $0x28] sm:$0xff] }
  0x2f   : >> { %v381_v24 = vld [vmem:[%s2098_s13 + $0xb0] sm:$0xff]  ;;  %v382_v26 = vld [vmem:[%s2098_s13 + $0xb8] sm:$0xff]  ;;  %v383_v28 = vld [vmem:[%s2098_s13 + $0xc0] sm:$0xff] }
  0x30   : >> { %456 = vxpose.xlu1.b32.cont [2/16] (narrow) %v376_v14, 16  ;;  %v365_v25 = vld [vmem:[%s2098_s13 + $0x30] sm:$0xff]  ;;  %v366_v27 = vld [vmem:[%s2098_s13 + $0x38] sm:$0xff]  ;;  %v367_v29 = vld [vmem:[%s2098_s13 + $0x40] sm:$0xff] }
  0x31   : >> { %424 = vxpose.xlu0.b32.cont [2/16] (narrow) %v360_v15, 16  ;;  %v384_v30 = vld [vmem:[%s2098_s13 + $0xc8] sm:$0xff]  ;;  %v385_v32 = vld [vmem:[%s2098_s13 + $0xd0] sm:$0xff]  ;;  %v386_v34 = vld [vmem:[%s2098_s13 + $0xd8] sm:$0xff] }
  0x32   : >> { %v368_v31 = vld [vmem:[%s2098_s13 + $0x48] sm:$0xff]  ;;  %v369_v33 = vld [vmem:[%s2098_s13 + $0x50] sm:$0xff]  ;;  %v370_v35 = vld [vmem:[%s2098_s13 + $0x58] sm:$0xff] }
  0x33   : >> { %v387_v36 = vld [vmem:[%s2098_s13 + $0xe0] sm:$0xff]  ;;  %v388_v38 = vld [vmem:[%s2098_s13 + $0xe8] sm:$0xff]  ;;  %v389_v40 = vld [vmem:[%s2098_s13 + $0xf0] sm:$0xff] }
  0x34   : >> { %457 = vxpose.xlu1.b32.cont [3/16] (narrow) %v377_v16, 16  ;;  %v371_v37 = vld [vmem:[%s2098_s13 + $0x60] sm:$0xff]  ;;  %v372_v39 = vld [vmem:[%s2098_s13 + $0x68] sm:$0xff]  ;;  %v373_v41 = vld [vmem:[%s2098_s13 + $0x70] sm:$0xff] }
  0x35   : >> { %425 = vxpose.xlu0.b32.cont [3/16] (narrow) %v361_v17, 16  ;;  %v390_v42 = vld [vmem:[%s2098_s13 + $0xf8] sm:$0xff]  ;;  %v407_v44 = vld [vmem:[%s2098_s13 + $0x180] sm:$0xff]  ;;  %v408_v46 = vld [vmem:[%s2098_s13 + $0x188] sm:$0xff] }
  0x36   : >> { %v374_v43 = vld [vmem:[%s2098_s13 + $0x78] sm:$0xff]  ;;  %v391_v45 = vld [vmem:[%s2098_s13 + $0x100] sm:$0xff]  ;;  %v392_v47 = vld [vmem:[%s2098_s13 + $0x108] sm:$0xff] }
  0x37   : >> { %v409_v48 = vld [vmem:[%s2098_s13 + $0x190] sm:$0xff]  ;;  %v410_v50 = vld [vmem:[%s2098_s13 + $0x198] sm:$0xff]  ;;  %v411_v52 = vld [vmem:[%s2098_s13 + $0x1a0] sm:$0xff] }
  0x38   : >> { %458 = vxpose.xlu1.b32.cont [4/16] (narrow) %v378_v18, 16  ;;  %v393_v49 = vld [vmem:[%s2098_s13 + $0x110] sm:$0xff]  ;;  %v394_v51 = vld [vmem:[%s2098_s13 + $0x118] sm:$0xff]  ;;  %v395_v53 = vld [vmem:[%s2098_s13 + $0x120] sm:$0xff] }
  0x39   : >> { %426 = vxpose.xlu0.b32.cont [4/16] (narrow) %v362_v19, 16  ;;  %v412_v54 = vld [vmem:[%s2098_s13 + $0x1a8] sm:$0xff]  ;;  %v413_v56 = vld [vmem:[%s2098_s13 + $0x1b0] sm:$0xff]  ;;  %v414_v58 = vld [vmem:[%s2098_s13 + $0x1b8] sm:$0xff] }
  0x3a   : >> { %v396_v55 = vld [vmem:[%s2098_s13 + $0x128] sm:$0xff]  ;;  %v397_v57 = vld [vmem:[%s2098_s13 + $0x130] sm:$0xff]  ;;  %v398_v59 = vld [vmem:[%s2098_s13 + $0x138] sm:$0xff] }
  0x3b   : >> { %v415_v60 = vld [vmem:[%s2098_s13 + $0x1c0] sm:$0xff]  ;;  %v416_v62 = vld [vmem:[%s2098_s13 + $0x1c8] sm:$0xff]  ;;  %v417_v0 = vld [vmem:[%s2098_s13 + $0x1d0] sm:$0xff] }
  0x3c   : >> { %459 = vxpose.xlu1.b32.cont [5/16] (narrow) %v379_v20, 16  ;;  %v399_v61 = vld [vmem:[%s2098_s13 + $0x140] sm:$0xff]  ;;  %v400_v63 = vld [vmem:[%s2098_s13 + $0x148] sm:$0xff]  ;;  %v401_v12 = vld [vmem:[%s2098_s13 + $0x150] sm:$0xff] }
  0x3d   : >> { %427 = vxpose.xlu0.b32.cont [5/16] (narrow) %v363_v21, 16  ;;  %v418_v13 = vld [vmem:[%s2098_s13 + $0x1d8] sm:$0xff]  ;;  %v419_v15 = vld [vmem:[%s2098_s13 + $0x1e0] sm:$0xff]  ;;  %v420_v17 = vld [vmem:[%s2098_s13 + $0x1e8] sm:$0xff] }
  0x3e   : >> { %v402_v14 = vld [vmem:[%s2098_s13 + $0x158] sm:$0xff]  ;;  %v403_v16 = vld [vmem:[%s2098_s13 + $0x160] sm:$0xff]  ;;  %v404_v18 = vld [vmem:[%s2098_s13 + $0x168] sm:$0xff] }
  0x3f   : >> { %v421_v19 = vld [vmem:[%s2098_s13 + $0x1f0] sm:$0xff]  ;;  %v422_v21 = vld [vmem:[%s2098_s13 + $0x1f8] sm:$0xff] }
  0x40   : >> { %460 = vxpose.xlu1.b32.cont [6/16] (narrow) %v380_v22, 16  ;;  %v405_v20 = vld [vmem:[%s2098_s13 + $0x170] sm:$0xff]  ;;  %v406_v22 = vld [vmem:[%s2098_s13 + $0x178] sm:$0xff] }
  0x41   : >> { %428 = vxpose.xlu0.b32.cont [6/16] (narrow) %v364_v23, 16  ;;  %v1921_v23 = vmov 0  }
  0x44   : >> { %461 = vxpose.xlu1.b32.cont [7/16] (narrow) %v381_v24, 16 }
  0x45   : >> { %429 = vxpose.xlu0.b32.cont [7/16] (narrow) %v365_v25, 16 }
  0x48   : >> { %462 = vxpose.xlu1.b32.cont [8/16] (narrow) %v382_v26, 16 }
  0x49   : >> { %430 = vxpose.xlu0.b32.cont [8/16] (narrow) %v366_v27, 16 }
  0x4c   : >> { %463 = vxpose.xlu1.b32.cont [9/16] (narrow) %v383_v28, 16 }
  0x4d   : >> { %431 = vxpose.xlu0.b32.cont [9/16] (narrow) %v367_v29, 16 }
  0x50   : >> { %464 = vxpose.xlu1.b32.cont [10/16] (narrow) %v384_v30, 16 }
  0x51   : >> { %432 = vxpose.xlu0.b32.cont [10/16] (narrow) %v368_v31, 16 }
  0x54   : >> { %465 = vxpose.xlu1.b32.cont [11/16] (narrow) %v385_v32, 16 }
  0x55   : >> { %433 = vxpose.xlu0.b32.cont [11/16] (narrow) %v369_v33, 16 }
  0x58   : >> { %466 = vxpose.xlu1.b32.cont [12/16] (narrow) %v386_v34, 16 }
  0x59   : >> { %434 = vxpose.xlu0.b32.cont [12/16] (narrow) %v370_v35, 16 }
  0x5c   : >> { %467 = vxpose.xlu1.b32.cont [13/16] (narrow) %v387_v36, 16 }
  0x5d   : >> { %435 = vxpose.xlu0.b32.cont [13/16] (narrow) %v371_v37, 16 }
  0x60   : >> { %468 = vxpose.xlu1.b32.cont [14/16] (narrow) %v388_v38, 16 }
  0x61   : >> { %436 = vxpose.xlu0.b32.cont [14/16] (narrow) %v372_v39, 16 }
  0x64   : >> { %469 = vxpose.xlu1.b32.cont [15/16] (narrow) %v389_v40, 16 }
  0x65   : >> { %437 = vxpose.xlu0.b32.cont [15/16] (narrow) %v373_v41, 16 }
  0x68   : >> { %470 = vxpose.xlu1.b32.end [16/16] (narrow) %v390_v42, 16 }
  0x69   : >> { %438 = vxpose.xlu0.b32.end [16/16] (narrow) %v374_v43, 16 }
  0x6c   : >> { %519 = vxpose.xlu1.b32.start [1/16] (narrow) %v407_v44, 16 }
  0x6d   : >> { %487 = vxpose.xlu0.b32.start [1/16] (narrow) %v391_v45, 16 }
  0x70   : >> { %520 = vxpose.xlu1.b32.cont [2/16] (narrow) %v408_v46, 16 }
  0x71   : >> { %488 = vxpose.xlu0.b32.cont [2/16] (narrow) %v392_v47, 16 }
  0x74   : >> { %521 = vxpose.xlu1.b32.cont [3/16] (narrow) %v409_v48, 16 }
  0x75   : >> { %489 = vxpose.xlu0.b32.cont [3/16] (narrow) %v393_v49, 16 }
  0x78   : >> { %522 = vxpose.xlu1.b32.cont [4/16] (narrow) %v410_v50, 16 }
  0x79   : >> { %490 = vxpose.xlu0.b32.cont [4/16] (narrow) %v394_v51, 16 }
  0x7c   : >> { %523 = vxpose.xlu1.b32.cont [5/16] (narrow) %v411_v52, 16 }
  0x7d   : >> { %491 = vxpose.xlu0.b32.cont [5/16] (narrow) %v395_v53, 16 }
  0x80   : >> { %524 = vxpose.xlu1.b32.cont [6/16] (narrow) %v412_v54, 16 }
  0x81   : >> { %492 = vxpose.xlu0.b32.cont [6/16] (narrow) %v396_v55, 16 }
  0x84   : >> { %525 = vxpose.xlu1.b32.cont [7/16] (narrow) %v413_v56, 16 }
  0x85   : >> { %493 = vxpose.xlu0.b32.cont [7/16] (narrow) %v397_v57, 16 }
  0x88   : >> { %526 = vxpose.xlu1.b32.cont [8/16] (narrow) %v414_v58, 16 }
  0x89   : >> { %494 = vxpose.xlu0.b32.cont [8/16] (narrow) %v398_v59, 16 }
  0x8c   : >> { %527 = vxpose.xlu1.b32.cont [9/16] (narrow) %v415_v60, 16 }
  0x8d   : >> { %495 = vxpose.xlu0.b32.cont [9/16] (narrow) %v399_v61, 16 }
  0x90   : >> { %528 = vxpose.xlu1.b32.cont [10/16] (narrow) %v416_v62, 16 }
  0x91   : >> { %496 = vxpose.xlu0.b32.cont [10/16] (narrow) %v400_v63, 16 }
  0x94   : >> { %529 = vxpose.xlu1.b32.cont [11/16] (narrow) %v417_v0, 16 }
  0x95   : >> { %497 = vxpose.xlu0.b32.cont [11/16] (narrow) %v401_v12, 16 }
  0x98   : >> { %530 = vxpose.xlu1.b32.cont [12/16] (narrow) %v418_v13, 16 }
  0x99   : >> { %498 = vxpose.xlu0.b32.cont [12/16] (narrow) %v402_v14, 16 }
  0x9c   : >> { %531 = vxpose.xlu1.b32.cont [13/16] (narrow) %v419_v15, 16 }
  0x9d   : >> { %499 = vxpose.xlu0.b32.cont [13/16] (narrow) %v403_v16, 16 }
  0xa0   : >> { %532 = vxpose.xlu1.b32.cont [14/16] (narrow) %v420_v17, 16 }
  0xa1   : >> { %500 = vxpose.xlu0.b32.cont [14/16] (narrow) %v404_v18, 16 }
  0xa4   : >> { %533 = vxpose.xlu1.b32.cont [15/16] (narrow) %v421_v19, 16 }
  0xa5   : >> { %501 = vxpose.xlu0.b32.cont [15/16] (narrow) %v405_v20, 16 }
  0xa8   : >> { %534 = vxpose.xlu1.b32.end [16/16] (narrow) %v422_v21, 16  ;;  %v2168_v24 = vpop.trf.xlu1 }
  0xa9   : >> { %502 = vxpose.xlu0.b32.end [16/16] (narrow) %v406_v22, 16  ;;  %v2170_v25 = vpop.trf.xlu0 }
  0xac   : >> { %v2172_v26 = vpop.trf.xlu1 }
  0xad   : >> { %v2174_v27 = vpop.trf.xlu0  ;;  %v604_v30 = vsel %vm595_vm0, %v2172_v26, -inf }
  0xae   : >> { %v596_v31 = vsel %vm595_vm0, %v2174_v27, -inf  ;;  %v605_v32 = vmax.f32 %v2168_v24, %v604_v30 }
  0xaf   : >> { %v597_v37 = vmax.f32 %v2170_v25, %v596_v31 }
  0xb0   : >> { %v606_v39 = vrot.slane %v605_v32, 4 }
  0xb1   : >> { %v598_v41 = vrot.slane %v597_v37, 4 }
  0xb2   : >> { %v607_v43 = vmax.f32 %v605_v32, %v606_v39 }
  0xb3   : >> { %v599_v45 = vmax.f32 %v597_v37, %v598_v41 }
  0xb4   : >> { %v608_v47 = vrot.slane %v607_v43, 2 }
  0xb5   : >> { %v600_v49 = vrot.slane %v599_v45, 2 }
  0xb6   : >> { %v609_v51 = vmax.f32 %v607_v43, %v608_v47 }
  0xb7   : >> { %v601_v53 = vmax.f32 %v599_v45, %v600_v49  ;;  %v561_v49 = vsub.s32 1, %v2071_v6 }
  0xb8   : >> { %v610_v55 = vrot.slane %v609_v51, 1 }
  0xb9   : >> { %v602_v57 = vrot.slane %v601_v53, 1 }
  0xba   : >> { %v2196_v59 = vmax.f32 %v609_v51, %v610_v55  ;;  %v554_v51 = vld [vmem:[%s553_s8] sm:$0xf] }
  0xbb   : >> { %v2198_v61 = vmax.f32 %v601_v53, %v602_v57 }
  0xbc   : >> { %v629_v63 = vsub.f32 %v2168_v24, %v2196_v59  ;;  %v633_v12 = vsub.f32 %v2172_v26, %v2196_v59 }
  0xbd   : >> { %v632_v13 = vsub.f32 %v2174_v27, %v2198_v61  ;;  %v628_v18 = vsub.f32 %v2170_v25, %v2198_v61 }
  0xbe   : >> { %v638_v15 = vmul.f32 1.442695, %v629_v63  ;;  %v646_v17 = vmul.f32 1.442695, %v633_v12  ;;  %v565_v63 = vsub.s32 2, %v2071_v6 }
  0xbf   : >> { %v644_v19 = vmul.f32 1.442695, %v632_v13  ;;  %v636_v30 = vmul.f32 1.442695, %v628_v18 }
  0xc0   : >> { %1744 = vpow2.f32 %v638_v15 }
  0xc1   : >> { %1746 = vpow2.f32 %v646_v17  ;;  %v566_v17 = vrot.slane %v554_v51, %v565_v63 }
  0xc2   : >> { %1748 = vpow2.f32 %v644_v19 }
  0xc3   : >> { %vm577_vm6 = vcmp.eq.s32.totalorder %v2077_v8, %v566_v17  ;;  %vm573_vm8 = vcmp.eq.s32.totalorder %v2071_v6, %v566_v17 }
  0xc6   : >> { %1743 = vset.pattern.permute.xlu1 %v1921_v23 }
  0xc7   : >> { %738 = vperm.xlu1 %1743, %v2048_v1  }
  0xcb   : >> { %793 = vperm.xlu1 %1743, %v2064_v5  }
  0xcf   : >> { %788 = vperm.xlu1 %1743, %v2058_v3  }
  0xd2   : >> { %1742 = vset.pattern.permute.xlu0 %v1921_v23 }
  0xd3   : >> { %743 = vperm.xlu0 %1742, %v2053_v2  }
  0xe8   : >> { %v2176_v28 = vpop.trf.xlu1 }
  0xe9   : >> { %v2178_v29 = vpop.trf.xlu0 }
  0xec   : >> { %v2185_v33 = vpop.trf.xlu1 }
  0xed   : >> { %v2187_v34 = vpop.trf.xlu0  ;;  %v620_v35 = vsel %vm595_vm0, %v2185_v33, -inf }
  0xee   : >> { %v612_v36 = vsel %vm595_vm0, %v2187_v34, -inf  ;;  %v621_v38 = vmax.f32 %v2176_v28, %v620_v35  ;;  %v1745_v35 = vpop.eup %1744 }
  0xef   : >> { %v613_v40 = vmax.f32 %v2178_v29, %v612_v36  ;;  %v1747_v36 = vpop.eup %1746 }
  0xf0   : >> { %v622_v42 = vrot.slane %v621_v38, 4  ;;  %v1749_v37 = vpop.eup %1748 }
  0xf1   : >> { %v614_v44 = vrot.slane %v613_v40, 4 }
  0xf2   : >> { %v623_v46 = vmax.f32 %v621_v38, %v622_v42  ;;  %v652_v42 = vsel %vm595_vm0, %v1749_v37, 0.0 }
  0xf3   : >> { %v615_v48 = vmax.f32 %v613_v40, %v614_v44  ;;  %v660_v40 = vsel %vm595_vm0, %v1747_v36, 0.0 }
  0xf4   : >> { %v624_v50 = vrot.slane %v623_v46, 2 }
  0xf5   : >> { %v616_v52 = vrot.slane %v615_v48, 2 }
  0xf6   : >> { %v625_v54 = vmax.f32 %v623_v46, %v624_v50  ;;  %v661_v46 = vadd.f32 %v1745_v35, %v660_v40 }
  0xf7   : >> { %v617_v56 = vmax.f32 %v615_v48, %v616_v52  ;;  %v557_v52 = vsub.s32 0, %v2071_v6 }
  0xf8   : >> { %v626_v58 = vrot.slane %v625_v54, 1 }
  0xf9   : >> { %v618_v60 = vrot.slane %v617_v56, 1 }
  0xfa   : >> { %v2200_v62 = vmax.f32 %v625_v54, %v626_v58  ;;  %v662_v54 = vrot.slane %v661_v46, 4  ;;  %v558_v58 = vrot.slane %v554_v51, %v557_v52 }
  0xfb   : >> { %v2204_v0 = vmax.f32 %v617_v56, %v618_v60  ;;  %v562_v56 = vrot.slane %v554_v51, %v561_v49  ;;  %v569_v60 = vsub.s32 3, %v2071_v6 }
  0xfc   : >> { %v635_v14 = vsub.f32 %v2185_v33, %v2200_v62  ;;  %v631_v20 = vsub.f32 %v2176_v28, %v2200_v62  ;;  %v663_v13 = vadd.f32 %v662_v54, %v661_v46  ;;  %vm575_vm2 = vcmp.eq.s32.totalorder %v2077_v8, %v558_v58 }
  0xfd   : >> { %v634_v16 = vsub.f32 %v2187_v34, %v2204_v0  ;;  %v630_v22 = vsub.f32 %v2178_v29, %v2204_v0  ;;  %vm576_vm1 = vcmp.eq.s32.totalorder %v2077_v8, %v562_v56  ;;  %vm572_vm3 = vcmp.eq.s32.totalorder %v2071_v6, %v562_v56 }
  0xfe   : >> { %v650_v21 = vmul.f32 1.442695, %v635_v14  ;;  %v642_v31 = vmul.f32 1.442695, %v631_v20  ;;  %v664_v19 = vrot.slane %v663_v13, 2  ;;  %v1922_v20 = vmov 0.0  }
  0xff   : >> { %v648_v23 = vmul.f32 1.442695, %v634_v16  ;;  %v640_v32 = vmul.f32 1.442695, %v630_v22  ;;  %v570_v16 = vrot.slane %v554_v51, %v569_v60  ;;  %vm571_vm4 = vcmp.eq.s32.totalorder %v2071_v6, %v558_v58 }
 0x100   : >> { %1750 = vpow2.f32 %v650_v21  ;;  %v2237_v21 = vsel %vm576_vm1, 1.0, %v1922_v20  ;;  %v665_v35 = vadd.f32 %v664_v19, %v663_v13  ;;  %v2249_v37 = vsel %vm571_vm4, 1.0, %v1922_v20 }
 0x101   : >> { %1752 = vpow2.f32 %v648_v23  ;;  %v2240_v23 = vsel %vm575_vm2, 1.0, %v1922_v20  ;;  %vm578_vm5 = vcmp.eq.s32.totalorder %v2077_v8, %v570_v16  ;;  %v701_v36 = vmul.f32 %v2237_v21, %v2172_v26 }
 0x102   : >> { %1754 = vpow2.f32 %v636_v30  ;;  %vm574_vm7 = vcmp.eq.s32.totalorder %v2071_v6, %v570_v16  ;;  %v2254_v40 = vsel %vm578_vm5, 1.0, %v1922_v20  ;;  %v666_v46 = vrot.slane %v665_v35, 1 }
 0x103   : >> { %1756 = vpow2.f32 %v642_v31 }
 0x104   : >> { %1758 = vpow2.f32 %v640_v32  ;;  %v2244_v32 = vsel %vm572_vm3, 1.0, %v1922_v20  ;;  %v667_v54 = vadd.f32 %v666_v46, %v665_v35 }
 0x106   : >> { %1760 = vlog2.f32 %v667_v54 }
 0x10d   : >> { %v1751_v38 = vpop.eup %1750 }
 0x10e   : >> { %v1753_v39 = vpop.eup %1752  ;;  %v676_v44 = vsel %vm595_vm0, %v1751_v38, 0.0 }
 0x10f   : >> { %v1755_v41 = vpop.eup %1754  ;;  %v668_v47 = vsel %vm595_vm0, %v1753_v39, 0.0  ;;  %v700_v39 = vmul.f32 %v2240_v23, %v2174_v27  ;;  %v2265_v27 = vsel %vm573_vm8, 1.0, %v1922_v20 }
 0x110   : >> { %v1757_v43 = vpop.eup %1756  ;;  %v653_v48 = vadd.f32 %v1755_v41, %v652_v42  ;;  %v2256_v42 = vsel %vm577_vm6, 1.0, %v1922_v20  ;;  %v698_v56 = vmul.f32 %v2265_v27, %v2178_v29 }
 0x111   : >> { %v1759_v45 = vpop.eup %1758  ;;  %v677_v50 = vadd.f32 %v1757_v43, %v676_v44  ;;  %v697_v43 = vmul.f32 %v2244_v32, %v2168_v24  ;;  %v2260_v44 = vsel %vm574_vm7, 1.0, %v1922_v20  ;;  %v704_v49 = vsel %vm595_vm0, %v700_v39, 0.0 }
 0x112   : >> { %v669_v53 = vadd.f32 %v1759_v45, %v668_v47  ;;  %v654_v55 = vrot.slane %v653_v48, 4  ;;  %v696_v45 = vmul.f32 %v2249_v37, %v2170_v25  ;;  %v712_v47 = vsel %vm595_vm0, %v701_v36, 0.0 }
 0x113   : >> { %v678_v57 = vrot.slane %v677_v50, 4  ;;  %v702_v24 = vmul.f32 %v2256_v42, %v2187_v34  ;;  %v713_v52 = vadd.f32 %v712_v47, %v697_v43  ;;  %v699_v25 = vmul.f32 %v2260_v44, %v2176_v28 }
 0x114   : >> { %v670_v12 = vrot.slane %v669_v53, 4  ;;  %v655_v14 = vadd.f32 %v654_v55, %v653_v48  ;;  %v705_v55 = vadd.f32 %v704_v49, %v696_v45 }
 0x115   : >> { %v679_v15 = vadd.f32 %v678_v57, %v677_v50  ;;  %v703_v50 = vmul.f32 %v2254_v40, %v2185_v33  ;;  %v720_v60 = vsel %vm595_vm0, %v702_v24, 0.0  ;;  %v714_v63 = vrot.slane %v713_v52, 4 }
 0x116   : >> { %v671_v18 = vadd.f32 %v670_v12, %v669_v53  ;;  %v656_v22 = vrot.slane %v655_v14, 2  ;;  %v706_v34 = vrot.slane %v705_v55, 4 }
 0x117   : >> { %v680_v30 = vrot.slane %v679_v15, 2  ;;  %v728_v58 = vsel %vm595_vm0, %v703_v50, 0.0 }
 0x118   : >> { %v672_v31 = vrot.slane %v671_v18, 2  ;;  %v657_v38 = vadd.f32 %v656_v22, %v655_v14  ;;  %v729_v13 = vadd.f32 %v728_v58, %v699_v25  ;;  %v721_v14 = vadd.f32 %v720_v60, %v698_v56 }
 0x119   : >> { %v681_v41 = vadd.f32 %v680_v30, %v679_v15  ;;  %v715_v15 = vadd.f32 %v714_v63, %v713_v52  ;;  %v707_v28 = vadd.f32 %v706_v34, %v705_v55 }
 0x11a   : >> { %v673_v26 = vadd.f32 %v672_v31, %v671_v18  ;;  %v658_v48 = vrot.slane %v657_v38, 1  ;;  %v730_v16 = vrot.slane %v729_v13, 4  ;;  %v722_v17 = vrot.slane %v721_v14, 4 }
 0x11b   : >> { %v682_v51 = vrot.slane %v681_v41, 1  ;;  %v716_v29 = vrot.slane %v715_v15, 2  ;;  %v708_v18 = vrot.slane %v707_v28, 2 }
 0x11c   : >> { %v674_v53 = vrot.slane %v673_v26, 1  ;;  %v659_v57 = vadd.f32 %v658_v48, %v657_v38  ;;  %v731_v19 = vadd.f32 %v730_v16, %v729_v13  ;;  %v723_v20 = vadd.f32 %v722_v17, %v721_v14  ;;  %v1761_v38 = vpop.eup %1760 }
 0x11d   : >> { %v683_v33 = vadd.f32 %v682_v51, %v681_v41  ;;  %v717_v22 = vadd.f32 %v716_v29, %v715_v15  ;;  %v709_v30 = vadd.f32 %v708_v18, %v707_v28  ;;  %v687_v56 = vmul.f32 0.6931472, %v1761_v38 }
 0x11e   : >> { %v675_v12 = vadd.f32 %v674_v53, %v673_v26  ;;  %1762 = vlog2.f32 %v659_v57  ;;  %v732_v31 = vrot.slane %v731_v19, 2  ;;  %v724_v35 = vrot.slane %v723_v20, 2 }
 0x11f   : >> { %1764 = vlog2.f32 %v683_v33  ;;  %v718_v51 = vrot.slane %v717_v22, 1  ;;  %v710_v57 = vrot.slane %v709_v30, 1 }
 0x120   : >> { %1766 = vlog2.f32 %v675_v12  ;;  %v733_v58 = vadd.f32 %v732_v31, %v731_v19  ;;  %v725_v60 = vadd.f32 %v724_v35, %v723_v20 }
 0x122   : >> { %v726_v38 = vrot.slane %v725_v60, 1 }
 0x12b   : >> { %v1763_v46 = vpop.eup %1762 }
 0x12c   : >> { %v1765_v24 = vpop.eup %1764  ;;  %v685_v13 = vmul.f32 0.6931472, %v1763_v46 }
 0x12d   : >> { %v1767_v52 = vpop.eup %1766  ;;  %v691_v14 = vmul.f32 0.6931472, %v1765_v24 }
 0x12e   : >> { %v689_v15 = vmul.f32 0.6931472, %v1767_v52  ;;  %v692_v35 = vadd.f32 %v685_v13, %v2198_v61 }
 0x142   : >> { %v739_v36 = vpop.permute.xlu1 %738 }
 0x143   : >> { %v746_v39 = vmul.f32 %v2249_v37, %v739_v36  ;;  %v747_v41 = vmul.f32 %v2244_v32, %v739_v36  ;;  %v748_v43 = vmul.f32 %v2265_v27, %v739_v36  ;;  %v749_v26 = vmul.f32 %v2260_v44, %v739_v36 }
 0x144   : >> { %v693_v36 = vadd.f32 %v687_v56, %v2196_v59 }
 0x146   : >> { %v794_v28 = vpop.permute.xlu1 %793 }
 0x14a   : >> { %v789_v52 = vpop.permute.xlu1 %788 }
 0x14e   : >> { %v744_v45 = vpop.permute.xlu0 %743 }
 0x14f   : >> { %v750_v47 = vmul.f32 %v2240_v23, %v744_v45  ;;  %v751_v48 = vmul.f32 %v2237_v21, %v744_v45  ;;  %v752_v49 = vmul.f32 %v2256_v42, %v744_v45  ;;  %v753_v50 = vmul.f32 %v2254_v40, %v744_v45 }
 0x150   : >> { %v719_v45 = vadd.f32 %v718_v51, %v717_v22  ;;  %v727_v22 = vadd.f32 %v726_v38, %v725_v60  ;;  %v800_v51 = vmul.f32 %v2240_v23, %v794_v28  ;;  %v796_v60 = vmul.f32 %v2249_v37, %v789_v52 }
 0x151   : >> { %v754_v53 = vsel %vm595_vm0, %v750_v47, 0.0  ;;  %v762_v54 = vsel %vm595_vm0, %v751_v48, 0.0  ;;  %v770_v55 = vsel %vm595_vm0, %v752_v49, 0.0  ;;  %v778_v25 = vsel %vm595_vm0, %v753_v50, 0.0 }
 0x152   : >> { %v755_v33 = vadd.f32 %v754_v53, %v746_v39  ;;  %v763_v63 = vadd.f32 %v762_v54, %v747_v41  ;;  %v771_v12 = vadd.f32 %v770_v55, %v748_v43  ;;  %v779_v34 = vadd.f32 %v778_v25, %v749_v26 }
 0x153   : >> { %v734_v47 = vrot.slane %v733_v58, 1  ;;  %v711_v39 = vadd.f32 %v710_v57, %v709_v30  ;;  %v695_v41 = vadd.f32 %v691_v14, %v2200_v62  ;;  %v694_v43 = vadd.f32 %v689_v15, %v2204_v0 }
 0x154   : >> { %v756_v16 = vrot.slane %v755_v33, 4  ;;  %v764_v17 = vrot.slane %v763_v63, 4  ;;  %v772_v29 = vrot.slane %v771_v12, 4  ;;  %v780_v18 = vrot.slane %v779_v34, 4 }
 0x155   : >> { %v837_v24 = vsub.f32 %v693_v36, %v719_v45  ;;  %v735_v59 = vadd.f32 %v734_v47, %v733_v58  ;;  %v836_v61 = vsub.f32 %v692_v35, %v711_v39  ;;  %v838_v56 = vsub.f32 %v694_v43, %v727_v22 }
 0x156   : >> { %v757_v48 = vadd.f32 %v756_v16, %v755_v33  ;;  %v765_v19 = vadd.f32 %v764_v17, %v763_v63  ;;  %v773_v20 = vadd.f32 %v772_v29, %v771_v12  ;;  %v781_v31 = vadd.f32 %v780_v18, %v779_v34 }
 0x157   : >> { %v839_v30 = vsub.f32 %v695_v41, %v735_v59  ;;  %v801_v62 = vmul.f32 %v2237_v21, %v794_v28  ;;  %v802_v12 = vmul.f32 %v2256_v42, %v794_v28  ;;  %v803_v58 = vmul.f32 %v2254_v40, %v794_v28 }
 0x158   : >> { %v758_v26 = vrot.slane %v757_v48, 2  ;;  %v766_v46 = vrot.slane %v765_v19, 2  ;;  %v774_v49 = vrot.slane %v773_v20, 2  ;;  %v782_v50 = vrot.slane %v781_v31, 2 }
 0x159   : >> { %v804_v23 = vsel %vm595_vm0, %v800_v51, 0.0  ;;  %v812_v16 = vsel %vm595_vm0, %v801_v62, 0.0  ;;  %v797_v21 = vmul.f32 %v2244_v32, %v789_v52  ;;  %v798_v17 = vmul.f32 %v2265_v27, %v789_v52 }
 0x15a   : >> { %v759_v53 = vadd.f32 %v758_v26, %v757_v48  ;;  %v767_v54 = vadd.f32 %v766_v46, %v765_v19  ;;  %v775_v55 = vadd.f32 %v774_v49, %v773_v20  ;;  %v783_v25 = vadd.f32 %v782_v50, %v781_v31 }
 0x15b   : >> { %v820_v40 = vsel %vm595_vm0, %v802_v12, 0.0  ;;  %v828_v28 = vsel %vm595_vm0, %v803_v58, 0.0  ;;  %v799_v37 = vmul.f32 %v2260_v44, %v789_v52  ;;  %v805_v45 = vadd.f32 %v804_v23, %v796_v60 }
 0x15c   : >> { %v760_v0 = vrot.slane %v759_v53, 1  ;;  %v768_v57 = vrot.slane %v767_v54, 1  ;;  %v776_v33 = vrot.slane %v775_v55, 1  ;;  %v784_v63 = vrot.slane %v783_v25, 1 }
 0x15d   : >> { %v813_v20 = vadd.f32 %v812_v16, %v797_v21  ;;  %v821_v31 = vadd.f32 %v820_v40, %v798_v17  ;;  %v829_v39 = vadd.f32 %v828_v28, %v799_v37  ;;  %v806_v43 = vrot.slane %v805_v45, 4 }
 0x15e   : >> { %v761_v34 = vadd.f32 %v760_v0, %v759_v53  ;;  %v769_v13 = vadd.f32 %v768_v57, %v767_v54  ;;  %v777_v14 = vadd.f32 %v776_v33, %v775_v55  ;;  %v785_v15 = vadd.f32 %v784_v63, %v783_v25 }
 0x15f   : >> { %v814_v26 = vrot.slane %v813_v20, 4  ;;  %v822_v46 = vrot.slane %v821_v31, 4  ;;  %v830_v49 = vrot.slane %v829_v39, 4  ;;  %v807_v44 = vadd.f32 %v806_v43, %v805_v45 }
 0x160   : >> { %v840_v29 = vmul.f32 %v836_v61, %v761_v34  ;;  %v841_v18 = vmul.f32 %v837_v24, %v769_v13  ;;  %v842_v36 = vmul.f32 %v838_v56, %v777_v14  ;;  %v843_v42 = vmul.f32 %v839_v30, %v785_v15 }
 0x161   : >> { %v815_v50 = vadd.f32 %v814_v26, %v813_v20  ;;  %v823_v24 = vadd.f32 %v822_v46, %v821_v31  ;;  %v831_v59 = vadd.f32 %v830_v49, %v829_v39  ;;  %v808_v22 = vrot.slane %v807_v44, 2 }
 0x162   : >> { %v844_v47 = vsub.f32 0.0, %v840_v29  ;;  %v845_v38 = vsub.f32 0.0, %v841_v18  ;;  %v846_v48 = vsub.f32 0.0, %v842_v36  ;;  %v847_v19 = vsub.f32 0.0, %v843_v42 }
 0x163   : >> { %v816_v51 = vrot.slane %v815_v50, 2  ;;  %v824_v52 = vrot.slane %v823_v24, 2  ;;  %v832_v53 = vrot.slane %v831_v59, 2  ;;  %v809_v54 = vadd.f32 %v808_v22, %v807_v44 }
 0x164   : >> { %v848_v32 = vmul.f32 1.442695, %v844_v47  ;;  %v850_v35 = vmul.f32 1.442695, %v845_v38  ;;  %v852_v27 = vmul.f32 1.442695, %v846_v48 }
 0x165   : >> { %v854_v41 = vmul.f32 1.442695, %v847_v19  ;;  %v817_v25 = vadd.f32 %v816_v51, %v815_v50  ;;  %v825_v30 = vadd.f32 %v824_v52, %v823_v24  ;;  %v833_v0 = vadd.f32 %v832_v53, %v831_v59  ;;  %v877_v50 = vld [vmem:[%s876_s12] sm:$0xf] }
 0x166   : >> { %1768 = vpow2.f32 %v848_v32  ;;  %v1923_v57 = vmov 1966171168   ;;  %v810_v58 = vrot.slane %v809_v54, 1 }
 0x167   : >> { %1770 = vpow2.f32 %v850_v35  ;;  %v885_v33 = vunpack.c.l.s4 %v1923_v57  ;;  %v818_v34 = vrot.slane %v817_v25, 1  ;;  %v826_v15 = vrot.slane %v825_v30, 1 }
 0x168   : >> { %1772 = vpow2.f32 %v852_v27  ;;  %v834_v17 = vrot.slane %v833_v0, 1  ;;  %v811_v45 = vadd.f32 %v810_v58, %v809_v54 }
 0x169   : >> { %1774 = vpow2.f32 %v854_v41  ;;  %v886_v40 = vunpack.c.0.s8 %v885_v33  ;;  %v819_v48 = vadd.f32 %v818_v34, %v817_v25  ;;  %v827_v31 = vadd.f32 %v826_v15, %v825_v30 }
 0x16a   : >> { %v835_v27 = vadd.f32 %v834_v17, %v833_v0 }
 0x16b   : >> { %v889_v39 = vsub.s32 %v886_v40, %v2071_v6 }
 0x173   : >> { %v1769_v55 = vpop.eup %1768 }
 0x174   : >> { %v1771_v61 = vpop.eup %1770  ;;  %v856_v56 = vsub.f32 1.0, %v1769_v55 }
 0x175   : >> { %v1773_v62 = vpop.eup %1772  ;;  %v857_v63 = vsub.f32 1.0, %v1771_v61 }
 0x176   : >> { %v1775_v12 = vpop.eup %1774  ;;  %v858_v23 = vsub.f32 1.0, %v1773_v62  ;;  %v860_v60 = vmax.f32 %v856_v56, 0.0 }
 0x177   : >> { %v859_v13 = vsub.f32 1.0, %v1775_v12  ;;  %v861_v14 = vmax.f32 %v857_v63, 0.0 }
 0x178   : >> { %v862_v16 = vmax.f32 %v858_v23, 0.0  ;;  %v864_v21 = vmul.f32 %v860_v60, %v840_v29 }
 0x179   : >> { %v863_v28 = vmax.f32 %v859_v13, 0.0  ;;  %v865_v37 = vmul.f32 %v861_v14, %v841_v18 }
 0x17a   : >> { %v866_v47 = vmul.f32 %v862_v16, %v842_v36  ;;  %v868_v38 = vmul.f32 %v864_v21, %v860_v60 }
 0x17b   : >> { %v867_v19 = vmul.f32 %v863_v28, %v843_v42  ;;  %v869_v20 = vmul.f32 %v865_v37, %v861_v14 }
 0x17c   : >> { %v870_v32 = vmul.f32 %v866_v47, %v862_v16  ;;  %v872_v35 = vmul.f32 %v868_v38, %v811_v45 }
 0x17d   : >> { %v871_v41 = vmul.f32 %v867_v19, %v863_v28  ;;  %v873_v29 = vmul.f32 %v869_v20, %v819_v48 }
 0x17e   : >> { %v874_v43 = vmul.f32 %v870_v32, %v827_v31 }
 0x17f   : >> { %v875_v26 = vmul.f32 %v871_v41, %v835_v27  ;;  %v882_v46 = vcombine.low %v872_v35, %v873_v29 }
 0x181   : >> { %v883_v18 = vcombine.low %v874_v43, %v875_v26  ;;  %v890_v49 = vrot.slane %v882_v46, %v889_v39 }
 0x183   : >> { %v897_v36 = vrot.slane %v883_v18, %v889_v39 }
 0x185   : >> { %v898_v44 = vcombine.low %v890_v49, %v897_v36 }
 0x187   : >> { %v905_v24 = vrot.slane %v898_v44, %v889_v39  ;;  %355 = sbr.rel (!%p353_p4) target bundleno = 41 (0x29), region = 106 }
 0x189   : >> { %v907_v42 = vadd.f32 %v905_v24, %v877_v50 }
 0x18b   : >> { %912 = vst.msk [vmem:[%s876_s12] sm:$0xf] %vm910_vm9, %v907_v42 }
 0x18c PF: > { %p1632_p5 = scmp.le.s32.totalorder %s2068_s30, 2500 }
 0x18d   : > { %s2314_s23 = smov (!%p1632_p5), 0  }
 0x18e   : > { %915 = sbr.rel (%p1632_p5) target bundleno = 759 (0x2f7), region = 55 }
 0x193 LB: >> { %s2320_s29 = sshll.u32 %s1918_s23, 9  ;;  %vm1160_vm10 = vcmask 1041408   ;;  %vm1489_vm7 = vcmp.lt.s32.totalorder %v334_v4, 512  ;;  %s921_s23 = sadd.s32 1, %s1918_s23   ;;  %s1918_s23 = sphi %s2314_s23, %s921_s23  }
 0x194   : >> { %s2324_s11 = scalar_lea.vmem %s2034_s24, %s2320_s29  ;;  %s1116_s30 = sshra.s32 %s2320_s29, 7 }
 0x195   : >> { %v940_v59 = vld [vmem:[%s2324_s11 + $0x80] sm:$0xff]  ;;  %v941_v51 = vld [vmem:[%s2324_s11 + $0x88] sm:$0xff]  ;;  %v942_v53 = vld [vmem:[%s2324_s11 + $0x90] sm:$0xff]  ;;  %s1118_s10 = scalar_lea.vmem %s2039_s7, %s1116_s30  ;;  %s1441_s13 = sadd.s32 %s2320_s29, %s1621_s18 }
 0x196   : >> { %v924_v22 = vld [vmem:[%s2324_s11] sm:$0xff]  ;;  %1020 = vxpose.xlu1.b32.start [1/16] (narrow) %v940_v59, 16  ;;  %v925_v52 = vld [vmem:[%s2324_s11 + $0x8] sm:$0xff]  ;;  %v926_v54 = vld [vmem:[%s2324_s11 + $0x10] sm:$0xff]  ;;  %s1455_s14 = scalar_lea.vmem %s2041_s6, %s1116_s30 [#allocation2]  ;;  %p918_p6 = scmp.ge.s32.totalorder %s921_s23, 2  }
 0x197   : >> { %988 = vxpose.xlu0.b32.start [1/16] (narrow) %v924_v22, 16  ;;  %v943_v55 = vld [vmem:[%s2324_s11 + $0x98] sm:$0xff]  ;;  %v944_v61 = vld [vmem:[%s2324_s11 + $0xa0] sm:$0xff]  ;;  %v945_v56 = vld [vmem:[%s2324_s11 + $0xa8] sm:$0xff] }
 0x198   : >> { %v927_v25 = vld [vmem:[%s2324_s11 + $0x18] sm:$0xff]  ;;  %v928_v30 = vld [vmem:[%s2324_s11 + $0x20] sm:$0xff]  ;;  %v929_v62 = vld [vmem:[%s2324_s11 + $0x28] sm:$0xff] }
 0x199   : >> { %v946_v0 = vld [vmem:[%s2324_s11 + $0xb0] sm:$0xff]  ;;  %v947_v33 = vld [vmem:[%s2324_s11 + $0xb8] sm:$0xff]  ;;  %v948_v12 = vld [vmem:[%s2324_s11 + $0xc0] sm:$0xff] }
 0x19a   : >> { %1021 = vxpose.xlu1.b32.cont [2/16] (narrow) %v941_v51, 16  ;;  %v930_v57 = vld [vmem:[%s2324_s11 + $0x30] sm:$0xff]  ;;  %v931_v63 = vld [vmem:[%s2324_s11 + $0x38] sm:$0xff]  ;;  %v932_v58 = vld [vmem:[%s2324_s11 + $0x40] sm:$0xff] }
 0x19b   : >> { %989 = vxpose.xlu0.b32.cont [2/16] (narrow) %v925_v52, 16  ;;  %v949_v23 = vld [vmem:[%s2324_s11 + $0xc8] sm:$0xff]  ;;  %v950_v34 = vld [vmem:[%s2324_s11 + $0xd0] sm:$0xff]  ;;  %v951_v14 = vld [vmem:[%s2324_s11 + $0xd8] sm:$0xff] }
 0x19c   : >> { %v933_v60 = vld [vmem:[%s2324_s11 + $0x48] sm:$0xff]  ;;  %v934_v13 = vld [vmem:[%s2324_s11 + $0x50] sm:$0xff]  ;;  %v935_v15 = vld [vmem:[%s2324_s11 + $0x58] sm:$0xff] }
 0x19d   : >> { %v952_v16 = vld [vmem:[%s2324_s11 + $0xe0] sm:$0xff]  ;;  %v953_v17 = vld [vmem:[%s2324_s11 + $0xe8] sm:$0xff]  ;;  %v954_v28 = vld [vmem:[%s2324_s11 + $0xf0] sm:$0xff] }
 0x19e   : >> { %1022 = vxpose.xlu1.b32.cont [3/16] (narrow) %v942_v53, 16  ;;  %v936_v21 = vld [vmem:[%s2324_s11 + $0x60] sm:$0xff]  ;;  %v937_v40 = vld [vmem:[%s2324_s11 + $0x68] sm:$0xff]  ;;  %v938_v37 = vld [vmem:[%s2324_s11 + $0x70] sm:$0xff] }
 0x19f   : >> { %990 = vxpose.xlu0.b32.cont [3/16] (narrow) %v926_v54, 16  ;;  %v955_v45 = vld [vmem:[%s2324_s11 + $0xf8] sm:$0xff]  ;;  %v972_v38 = vld [vmem:[%s2324_s11 + $0x180] sm:$0xff]  ;;  %v973_v19 = vld [vmem:[%s2324_s11 + $0x188] sm:$0xff] }
 0x1a0   : >> { %v939_v47 = vld [vmem:[%s2324_s11 + $0x78] sm:$0xff]  ;;  %v956_v48 = vld [vmem:[%s2324_s11 + $0x100] sm:$0xff]  ;;  %v957_v20 = vld [vmem:[%s2324_s11 + $0x108] sm:$0xff] }
 0x1a1   : >> { %v974_v31 = vld [vmem:[%s2324_s11 + $0x190] sm:$0xff]  ;;  %v975_v35 = vld [vmem:[%s2324_s11 + $0x198] sm:$0xff]  ;;  %v976_v39 = vld [vmem:[%s2324_s11 + $0x1a0] sm:$0xff] }
 0x1a2   : >> { %1023 = vxpose.xlu1.b32.cont [4/16] (narrow) %v943_v55, 16  ;;  %v958_v32 = vld [vmem:[%s2324_s11 + $0x110] sm:$0xff]  ;;  %v959_v27 = vld [vmem:[%s2324_s11 + $0x118] sm:$0xff]  ;;  %v960_v41 = vld [vmem:[%s2324_s11 + $0x120] sm:$0xff] }
 0x1a3   : >> { %991 = vxpose.xlu0.b32.cont [4/16] (narrow) %v927_v25, 16  ;;  %v977_v29 = vld [vmem:[%s2324_s11 + $0x1a8] sm:$0xff]  ;;  %v978_v26 = vld [vmem:[%s2324_s11 + $0x1b0] sm:$0xff]  ;;  %v979_v18 = vld [vmem:[%s2324_s11 + $0x1b8] sm:$0xff] }
 0x1a4   : >> { %v961_v43 = vld [vmem:[%s2324_s11 + $0x128] sm:$0xff]  ;;  %v962_v46 = vld [vmem:[%s2324_s11 + $0x130] sm:$0xff]  ;;  %v963_v49 = vld [vmem:[%s2324_s11 + $0x138] sm:$0xff] }
 0x1a5   : >> { %v980_v36 = vld [vmem:[%s2324_s11 + $0x1c0] sm:$0xff]  ;;  %v981_v50 = vld [vmem:[%s2324_s11 + $0x1c8] sm:$0xff]  ;;  %v982_v42 = vld [vmem:[%s2324_s11 + $0x1d0] sm:$0xff] }
 0x1a6   : >> { %1024 = vxpose.xlu1.b32.cont [5/16] (narrow) %v944_v61, 16  ;;  %v964_v44 = vld [vmem:[%s2324_s11 + $0x140] sm:$0xff]  ;;  %v965_v24 = vld [vmem:[%s2324_s11 + $0x148] sm:$0xff]  ;;  %v966_v59 = vld [vmem:[%s2324_s11 + $0x150] sm:$0xff] }
 0x1a7   : >> { %992 = vxpose.xlu0.b32.cont [5/16] (narrow) %v928_v30, 16  ;;  %v983_v22 = vld [vmem:[%s2324_s11 + $0x1d8] sm:$0xff]  ;;  %v984_v52 = vld [vmem:[%s2324_s11 + $0x1e0] sm:$0xff]  ;;  %v985_v54 = vld [vmem:[%s2324_s11 + $0x1e8] sm:$0xff] }
 0x1a8   : >> { %v967_v51 = vld [vmem:[%s2324_s11 + $0x158] sm:$0xff]  ;;  %v968_v53 = vld [vmem:[%s2324_s11 + $0x160] sm:$0xff]  ;;  %v969_v55 = vld [vmem:[%s2324_s11 + $0x168] sm:$0xff] }
 0x1a9   : >> { %v986_v25 = vld [vmem:[%s2324_s11 + $0x1f0] sm:$0xff]  ;;  %v987_v30 = vld [vmem:[%s2324_s11 + $0x1f8] sm:$0xff] }
 0x1aa   : >> { %1025 = vxpose.xlu1.b32.cont [6/16] (narrow) %v945_v56, 16  ;;  %v970_v61 = vld [vmem:[%s2324_s11 + $0x170] sm:$0xff]  ;;  %v971_v56 = vld [vmem:[%s2324_s11 + $0x178] sm:$0xff] }
 0x1ab   : >> { %993 = vxpose.xlu0.b32.cont [6/16] (narrow) %v929_v62, 16  ;;  %v1924_v62 = vmov 0  }
 0x1ae   : >> { %1026 = vxpose.xlu1.b32.cont [7/16] (narrow) %v946_v0, 16 }
 0x1af   : >> { %994 = vxpose.xlu0.b32.cont [7/16] (narrow) %v930_v57, 16 }
 0x1b2   : >> { %1027 = vxpose.xlu1.b32.cont [8/16] (narrow) %v947_v33, 16 }
 0x1b3   : >> { %995 = vxpose.xlu0.b32.cont [8/16] (narrow) %v931_v63, 16 }
 0x1b6   : >> { %1028 = vxpose.xlu1.b32.cont [9/16] (narrow) %v948_v12, 16 }
 0x1b7   : >> { %996 = vxpose.xlu0.b32.cont [9/16] (narrow) %v932_v58, 16 }
 0x1ba   : >> { %1029 = vxpose.xlu1.b32.cont [10/16] (narrow) %v949_v23, 16 }
 0x1bb   : >> { %997 = vxpose.xlu0.b32.cont [10/16] (narrow) %v933_v60, 16 }
 0x1be   : >> { %1030 = vxpose.xlu1.b32.cont [11/16] (narrow) %v950_v34, 16 }
 0x1bf   : >> { %998 = vxpose.xlu0.b32.cont [11/16] (narrow) %v934_v13, 16 }
 0x1c2   : >> { %1031 = vxpose.xlu1.b32.cont [12/16] (narrow) %v951_v14, 16 }
 0x1c3   : >> { %999 = vxpose.xlu0.b32.cont [12/16] (narrow) %v935_v15, 16 }
 0x1c6   : >> { %1032 = vxpose.xlu1.b32.cont [13/16] (narrow) %v952_v16, 16 }
 0x1c7   : >> { %1000 = vxpose.xlu0.b32.cont [13/16] (narrow) %v936_v21, 16 }
 0x1ca   : >> { %1033 = vxpose.xlu1.b32.cont [14/16] (narrow) %v953_v17, 16 }
 0x1cb   : >> { %1001 = vxpose.xlu0.b32.cont [14/16] (narrow) %v937_v40, 16 }
 0x1ce   : >> { %1034 = vxpose.xlu1.b32.cont [15/16] (narrow) %v954_v28, 16 }
 0x1cf   : >> { %1002 = vxpose.xlu0.b32.cont [15/16] (narrow) %v938_v37, 16 }
 0x1d2   : >> { %1035 = vxpose.xlu1.b32.end [16/16] (narrow) %v955_v45, 16 }
 0x1d3   : >> { %1003 = vxpose.xlu0.b32.end [16/16] (narrow) %v939_v47, 16 }
 0x1d6   : >> { %1084 = vxpose.xlu1.b32.start [1/16] (narrow) %v972_v38, 16 }
 0x1d7   : >> { %1052 = vxpose.xlu0.b32.start [1/16] (narrow) %v956_v48, 16 }
 0x1da   : >> { %1085 = vxpose.xlu1.b32.cont [2/16] (narrow) %v973_v19, 16 }
 0x1db   : >> { %1053 = vxpose.xlu0.b32.cont [2/16] (narrow) %v957_v20, 16 }
 0x1de   : >> { %1086 = vxpose.xlu1.b32.cont [3/16] (narrow) %v974_v31, 16 }
 0x1df   : >> { %1054 = vxpose.xlu0.b32.cont [3/16] (narrow) %v958_v32, 16 }
 0x1e2   : >> { %1087 = vxpose.xlu1.b32.cont [4/16] (narrow) %v975_v35, 16 }
 0x1e3   : >> { %1055 = vxpose.xlu0.b32.cont [4/16] (narrow) %v959_v27, 16 }
 0x1e6   : >> { %1088 = vxpose.xlu1.b32.cont [5/16] (narrow) %v976_v39, 16 }
 0x1e7   : >> { %1056 = vxpose.xlu0.b32.cont [5/16] (narrow) %v960_v41, 16 }
 0x1ea   : >> { %1089 = vxpose.xlu1.b32.cont [6/16] (narrow) %v977_v29, 16 }
 0x1eb   : >> { %1057 = vxpose.xlu0.b32.cont [6/16] (narrow) %v961_v43, 16 }
 0x1ee   : >> { %1090 = vxpose.xlu1.b32.cont [7/16] (narrow) %v978_v26, 16 }
 0x1ef   : >> { %1058 = vxpose.xlu0.b32.cont [7/16] (narrow) %v962_v46, 16 }
 0x1f2   : >> { %1091 = vxpose.xlu1.b32.cont [8/16] (narrow) %v979_v18, 16 }
 0x1f3   : >> { %1059 = vxpose.xlu0.b32.cont [8/16] (narrow) %v963_v49, 16 }
 0x1f6   : >> { %1092 = vxpose.xlu1.b32.cont [9/16] (narrow) %v980_v36, 16 }
 0x1f7   : >> { %1060 = vxpose.xlu0.b32.cont [9/16] (narrow) %v964_v44, 16 }
 0x1fa   : >> { %1093 = vxpose.xlu1.b32.cont [10/16] (narrow) %v981_v50, 16 }
 0x1fb   : >> { %1061 = vxpose.xlu0.b32.cont [10/16] (narrow) %v965_v24, 16 }
 0x1fe   : >> { %1094 = vxpose.xlu1.b32.cont [11/16] (narrow) %v982_v42, 16 }
 0x1ff   : >> { %1062 = vxpose.xlu0.b32.cont [11/16] (narrow) %v966_v59, 16 }
 0x202   : >> { %1095 = vxpose.xlu1.b32.cont [12/16] (narrow) %v983_v22, 16 }
 0x203   : >> { %1063 = vxpose.xlu0.b32.cont [12/16] (narrow) %v967_v51, 16 }
 0x206   : >> { %1096 = vxpose.xlu1.b32.cont [13/16] (narrow) %v984_v52, 16 }
 0x207   : >> { %1064 = vxpose.xlu0.b32.cont [13/16] (narrow) %v968_v53, 16 }
 0x20a   : >> { %1097 = vxpose.xlu1.b32.cont [14/16] (narrow) %v985_v54, 16 }
 0x20b   : >> { %1065 = vxpose.xlu0.b32.cont [14/16] (narrow) %v969_v55, 16 }
 0x20e   : >> { %1098 = vxpose.xlu1.b32.cont [15/16] (narrow) %v986_v25, 16 }
 0x20f   : >> { %1066 = vxpose.xlu0.b32.cont [15/16] (narrow) %v970_v61, 16 }
 0x212   : >> { %1099 = vxpose.xlu1.b32.end [16/16] (narrow) %v987_v30, 16  ;;  %v2394_v0 = vpop.trf.xlu1 }
 0x213   : >> { %1067 = vxpose.xlu0.b32.end [16/16] (narrow) %v971_v56, 16  ;;  %v2396_v57 = vpop.trf.xlu0 }
 0x216   : >> { %v2398_v33 = vpop.trf.xlu1 }
 0x217   : >> { %v2400_v63 = vpop.trf.xlu0  ;;  %v1169_v23 = vsel %vm1160_vm10, %v2398_v33, -inf }
 0x218   : >> { %v1161_v60 = vsel %vm1160_vm10, %v2400_v63, -inf  ;;  %v1170_v34 = vmax.f32 %v2394_v0, %v1169_v23 }
 0x219   : >> { %v1162_v21 = vmax.f32 %v2396_v57, %v1161_v60 }
 0x21a   : >> { %v1171_v40 = vrot.slane %v1170_v34, 4 }
 0x21b   : >> { %v1163_v37 = vrot.slane %v1162_v21, 4 }
 0x21c   : >> { %v1172_v47 = vmax.f32 %v1170_v34, %v1171_v40 }
 0x21d   : >> { %v1164_v48 = vmax.f32 %v1162_v21, %v1163_v37 }
 0x21e   : >> { %v1173_v20 = vrot.slane %v1172_v47, 2 }
 0x21f   : >> { %v1165_v32 = vrot.slane %v1164_v48, 2 }
 0x220   : >> { %v1174_v27 = vmax.f32 %v1172_v47, %v1173_v20 }
 0x221   : >> { %v1166_v41 = vmax.f32 %v1164_v48, %v1165_v32  ;;  %v1126_v32 = vsub.s32 1, %v2071_v6 }
 0x222   : >> { %v1175_v43 = vrot.slane %v1174_v27, 1 }
 0x223   : >> { %v1167_v46 = vrot.slane %v1166_v41, 1 }
 0x224   : >> { %v2422_v49 = vmax.f32 %v1174_v27, %v1175_v43  ;;  %v1119_v27 = vld [vmem:[%s1118_s10] sm:$0xf] }
 0x225   : >> { %v2424_v44 = vmax.f32 %v1166_v41, %v1167_v46 }
 0x226   : >> { %v1194_v24 = vsub.f32 %v2394_v0, %v2422_v49  ;;  %v1198_v59 = vsub.f32 %v2398_v33, %v2422_v49 }
 0x227   : >> { %v1197_v22 = vsub.f32 %v2400_v63, %v2424_v44  ;;  %v1193_v55 = vsub.f32 %v2396_v57, %v2424_v44 }
 0x228   : >> { %v1203_v52 = vmul.f32 1.442695, %v1194_v24  ;;  %v1211_v54 = vmul.f32 1.442695, %v1198_v59  ;;  %v1130_v24 = vsub.s32 2, %v2071_v6 }
 0x229   : >> { %v1209_v25 = vmul.f32 1.442695, %v1197_v22  ;;  %v1201_v23 = vmul.f32 1.442695, %v1193_v55 }
 0x22a   : >> { %1778 = vpow2.f32 %v1203_v52 }
 0x22b   : >> { %1780 = vpow2.f32 %v1211_v54  ;;  %v1131_v54 = vrot.slane %v1119_v27, %v1130_v24 }
 0x22c   : >> { %1782 = vpow2.f32 %v1209_v25 }
 0x22d   : >> { %vm1142_vm0 = vcmp.eq.s32.totalorder %v2077_v8, %v1131_v54  ;;  %vm1138_vm2 = vcmp.eq.s32.totalorder %v2071_v6, %v1131_v54 }
 0x230   : >> { %1777 = vset.pattern.permute.xlu1 %v1924_v62 }
 0x231   : >> { %1303 = vperm.xlu1 %1777, %v2048_v1  }
 0x235   : >> { %1358 = vperm.xlu1 %1777, %v2064_v5  }
 0x239   : >> { %1353 = vperm.xlu1 %1777, %v2058_v3  }
 0x23c   : >> { %1776 = vset.pattern.permute.xlu0 %v1924_v62 }
 0x23d   : >> { %1308 = vperm.xlu0 %1776, %v2053_v2  }
 0x252   : >> { %v2402_v12 = vpop.trf.xlu1 }
 0x253   : >> { %v2404_v58 = vpop.trf.xlu0 }
 0x256   : >> { %v2411_v13 = vpop.trf.xlu1 }
 0x257   : >> { %v2413_v14 = vpop.trf.xlu0  ;;  %v1185_v15 = vsel %vm1160_vm10, %v2411_v13, -inf }
 0x258   : >> { %v1177_v16 = vsel %vm1160_vm10, %v2413_v14, -inf  ;;  %v1186_v17 = vmax.f32 %v2402_v12, %v1185_v15  ;;  %v1779_v15 = vpop.eup %1778 }
 0x259   : >> { %v1178_v28 = vmax.f32 %v2404_v58, %v1177_v16  ;;  %v1781_v16 = vpop.eup %1780 }
 0x25a   : >> { %v1187_v45 = vrot.slane %v1186_v17, 4  ;;  %v1783_v21 = vpop.eup %1782 }
 0x25b   : >> { %v1179_v38 = vrot.slane %v1178_v28, 4 }
 0x25c   : >> { %v1188_v19 = vmax.f32 %v1186_v17, %v1187_v45  ;;  %v1217_v45 = vsel %vm1160_vm10, %v1783_v21, 0.0 }
 0x25d   : >> { %v1180_v31 = vmax.f32 %v1178_v28, %v1179_v38  ;;  %v1225_v28 = vsel %vm1160_vm10, %v1781_v16, 0.0 }
 0x25e   : >> { %v1189_v35 = vrot.slane %v1188_v19, 2 }
 0x25f   : >> { %v1181_v39 = vrot.slane %v1180_v31, 2 }
 0x260   : >> { %v1190_v29 = vmax.f32 %v1188_v19, %v1189_v35  ;;  %v1226_v19 = vadd.f32 %v1779_v15, %v1225_v28 }
 0x261   : >> { %v1182_v26 = vmax.f32 %v1180_v31, %v1181_v39  ;;  %v1122_v39 = vsub.s32 0, %v2071_v6 }
 0x262   : >> { %v1191_v18 = vrot.slane %v1190_v29, 1 }
 0x263   : >> { %v1183_v36 = vrot.slane %v1182_v26, 1 }
 0x264   : >> { %v2426_v50 = vmax.f32 %v1190_v29, %v1191_v18  ;;  %v1227_v29 = vrot.slane %v1226_v19, 4  ;;  %v1123_v18 = vrot.slane %v1119_v27, %v1122_v39 }
 0x265   : >> { %v2430_v42 = vmax.f32 %v1182_v26, %v1183_v36  ;;  %v1127_v26 = vrot.slane %v1119_v27, %v1126_v32  ;;  %v1134_v36 = vsub.s32 3, %v2071_v6 }
 0x266   : >> { %v1200_v51 = vsub.f32 %v2411_v13, %v2426_v50  ;;  %v1196_v61 = vsub.f32 %v2402_v12, %v2426_v50  ;;  %v1228_v22 = vadd.f32 %v1227_v29, %v1226_v19  ;;  %vm1140_vm12 = vcmp.eq.s32.totalorder %v2077_v8, %v1123_v18 }
 0x267   : >> { %v1199_v53 = vsub.f32 %v2413_v14, %v2430_v42  ;;  %v1195_v56 = vsub.f32 %v2404_v58, %v2430_v42  ;;  %vm1141_vm11 = vcmp.eq.s32.totalorder %v2077_v8, %v1127_v26  ;;  %vm1137_vm13 = vcmp.eq.s32.totalorder %v2071_v6, %v1127_v26 }
 0x268   : >> { %v1215_v30 = vmul.f32 1.442695, %v1200_v51  ;;  %v1207_v60 = vmul.f32 1.442695, %v1196_v61  ;;  %v1229_v25 = vrot.slane %v1228_v22, 2  ;;  %v1925_v61 = vmov 0.0  }
 0x269   : >> { %v1213_v62 = vmul.f32 1.442695, %v1199_v53  ;;  %v1205_v34 = vmul.f32 1.442695, %v1195_v56  ;;  %v1135_v53 = vrot.slane %v1119_v27, %v1134_v36  ;;  %vm1136_vm14 = vcmp.eq.s32.totalorder %v2071_v6, %v1123_v18 }
 0x26a   : >> { %1784 = vpow2.f32 %v1215_v30  ;;  %v2461_v30 = vsel %vm1141_vm11, 1.0, %v1925_v61  ;;  %v1230_v15 = vadd.f32 %v1229_v25, %v1228_v22  ;;  %v2473_v21 = vsel %vm1136_vm14, 1.0, %v1925_v61 }
 0x26b   : >> { %1786 = vpow2.f32 %v1213_v62  ;;  %v2464_v62 = vsel %vm1140_vm12, 1.0, %v1925_v61  ;;  %vm1143_vm15 = vcmp.eq.s32.totalorder %v2077_v8, %v1135_v53  ;;  %v1266_v16 = vmul.f32 %v2461_v30, %v2398_v33 }
 0x26c   : >> { %1788 = vpow2.f32 %v1201_v23  ;;  %vm1139_vm1 = vcmp.eq.s32.totalorder %v2071_v6, %v1135_v53  ;;  %v2478_v28 = vsel %vm1143_vm15, 1.0, %v1925_v61  ;;  %v1231_v19 = vrot.slane %v1230_v15, 1 }
 0x26d   : >> { %1790 = vpow2.f32 %v1207_v60 }
 0x26e   : >> { %1792 = vpow2.f32 %v1205_v34  ;;  %v2468_v34 = vsel %vm1137_vm13, 1.0, %v1925_v61  ;;  %v1232_v29 = vadd.f32 %v1231_v19, %v1230_v15 }
 0x270   : >> { %1794 = vlog2.f32 %v1232_v29 }
 0x277   : >> { %v1785_v17 = vpop.eup %1784 }
 0x278   : >> { %v1787_v40 = vpop.eup %1786  ;;  %v1241_v38 = vsel %vm1160_vm10, %v1785_v17, 0.0 }
 0x279   : >> { %v1789_v37 = vpop.eup %1788  ;;  %v1233_v20 = vsel %vm1160_vm10, %v1787_v40, 0.0  ;;  %v1265_v40 = vmul.f32 %v2464_v62, %v2400_v63  ;;  %v2489_v63 = vsel %vm1138_vm2, 1.0, %v1925_v61 }
 0x27a   : >> { %v1791_v47 = vpop.eup %1790  ;;  %v1218_v31 = vadd.f32 %v1789_v37, %v1217_v45  ;;  %v2480_v45 = vsel %vm1142_vm0, 1.0, %v1925_v61  ;;  %v1263_v26 = vmul.f32 %v2489_v63, %v2404_v58 }
 0x27b   : >> { %v1793_v48 = vpop.eup %1792  ;;  %v1242_v35 = vadd.f32 %v1791_v47, %v1241_v38  ;;  %v1262_v47 = vmul.f32 %v2468_v34, %v2394_v0  ;;  %v2484_v38 = vsel %vm1139_vm1, 1.0, %v1925_v61  ;;  %v1269_v32 = vsel %vm1160_vm10, %v1265_v40, 0.0 }
 0x27c   : >> { %v1234_v41 = vadd.f32 %v1793_v48, %v1233_v20  ;;  %v1219_v43 = vrot.slane %v1218_v31, 4  ;;  %v1261_v48 = vmul.f32 %v2473_v21, %v2396_v57  ;;  %v1277_v20 = vsel %vm1160_vm10, %v1266_v16, 0.0 }
 0x27d   : >> { %v1243_v46 = vrot.slane %v1242_v35, 4  ;;  %v1267_v0 = vmul.f32 %v2480_v45, %v2413_v14  ;;  %v1278_v39 = vadd.f32 %v1277_v20, %v1262_v47  ;;  %v1264_v57 = vmul.f32 %v2484_v38, %v2402_v12 }
 0x27e   : >> { %v1235_v59 = vrot.slane %v1234_v41, 4  ;;  %v1220_v51 = vadd.f32 %v1219_v43, %v1218_v31  ;;  %v1270_v43 = vadd.f32 %v1269_v32, %v1261_v48 }
 0x27f   : >> { %v1244_v52 = vadd.f32 %v1243_v46, %v1242_v35  ;;  %v1268_v35 = vmul.f32 %v2478_v28, %v2411_v13  ;;  %v1285_v36 = vsel %vm1160_vm10, %v1267_v0, 0.0  ;;  %v1279_v24 = vrot.slane %v1278_v39, 4 }
 0x280   : >> { %v1236_v55 = vadd.f32 %v1235_v59, %v1234_v41  ;;  %v1221_v56 = vrot.slane %v1220_v51, 2  ;;  %v1271_v14 = vrot.slane %v1270_v43, 4 }
 0x281   : >> { %v1245_v23 = vrot.slane %v1244_v52, 2  ;;  %v1293_v18 = vsel %vm1160_vm10, %v1268_v35, 0.0 }
 0x282   : >> { %v1237_v60 = vrot.slane %v1236_v55, 2  ;;  %v1222_v17 = vadd.f32 %v1221_v56, %v1220_v51  ;;  %v1294_v22 = vadd.f32 %v1293_v18, %v1264_v57  ;;  %v1286_v51 = vadd.f32 %v1285_v36, %v1263_v26 }
 0x283   : >> { %v1246_v37 = vadd.f32 %v1245_v23, %v1244_v52  ;;  %v1280_v52 = vadd.f32 %v1279_v24, %v1278_v39  ;;  %v1272_v12 = vadd.f32 %v1271_v14, %v1270_v43 }
 0x284   : >> { %v1238_v33 = vadd.f32 %v1237_v60, %v1236_v55  ;;  %v1223_v31 = vrot.slane %v1222_v17, 1  ;;  %v1295_v53 = vrot.slane %v1294_v22, 4  ;;  %v1287_v54 = vrot.slane %v1286_v51, 4 }
 0x285   : >> { %v1247_v27 = vrot.slane %v1246_v37, 1  ;;  %v1281_v58 = vrot.slane %v1280_v52, 2  ;;  %v1273_v55 = vrot.slane %v1272_v12, 2 }
 0x286   : >> { %v1239_v41 = vrot.slane %v1238_v33, 1  ;;  %v1224_v46 = vadd.f32 %v1223_v31, %v1222_v17  ;;  %v1296_v25 = vadd.f32 %v1295_v53, %v1294_v22  ;;  %v1288_v61 = vadd.f32 %v1287_v54, %v1286_v51  ;;  %v1795_v17 = vpop.eup %1794 }
 0x287   : >> { %v1248_v13 = vadd.f32 %v1247_v27, %v1246_v37  ;;  %v1282_v56 = vadd.f32 %v1281_v58, %v1280_v52  ;;  %v1274_v23 = vadd.f32 %v1273_v55, %v1272_v12  ;;  %v1252_v26 = vmul.f32 0.6931472, %v1795_v17 }
 0x288   : >> { %v1240_v59 = vadd.f32 %v1239_v41, %v1238_v33  ;;  %1796 = vlog2.f32 %v1224_v46  ;;  %v1297_v60 = vrot.slane %v1296_v25, 2  ;;  %v1289_v15 = vrot.slane %v1288_v61, 2 }
 0x289   : >> { %1798 = vlog2.f32 %v1248_v13  ;;  %v1283_v27 = vrot.slane %v1282_v56, 1  ;;  %v1275_v46 = vrot.slane %v1274_v23, 1 }
 0x28a   : >> { %1800 = vlog2.f32 %v1240_v59  ;;  %v1298_v18 = vadd.f32 %v1297_v60, %v1296_v25  ;;  %v1290_v36 = vadd.f32 %v1289_v15, %v1288_v61 }
 0x28c   : >> { %v1291_v17 = vrot.slane %v1290_v36, 1 }
 0x295   : >> { %v1797_v19 = vpop.eup %1796 }
 0x296   : >> { %v1799_v0 = vpop.eup %1798  ;;  %v1250_v22 = vmul.f32 0.6931472, %v1797_v19 }
 0x297   : >> { %v1801_v39 = vpop.eup %1800  ;;  %v1256_v51 = vmul.f32 0.6931472, %v1799_v0 }
 0x298   : >> { %v1254_v52 = vmul.f32 0.6931472, %v1801_v39  ;;  %v1257_v15 = vadd.f32 %v1250_v22, %v2424_v44 }
 0x2ac   : >> { %v1304_v16 = vpop.permute.xlu1 %1303 }
 0x2ad   : >> { %v1311_v40 = vmul.f32 %v2473_v21, %v1304_v16  ;;  %v1312_v37 = vmul.f32 %v2468_v34, %v1304_v16  ;;  %v1313_v47 = vmul.f32 %v2489_v63, %v1304_v16  ;;  %v1314_v33 = vmul.f32 %v2484_v38, %v1304_v16 }
 0x2ae   : >> { %v1258_v16 = vadd.f32 %v1252_v26, %v2422_v49 }
 0x2b0   : >> { %v1359_v12 = vpop.permute.xlu1 %1358 }
 0x2b4   : >> { %v1354_v39 = vpop.permute.xlu1 %1353 }
 0x2b8   : >> { %v1309_v48 = vpop.permute.xlu0 %1308 }
 0x2b9   : >> { %v1315_v20 = vmul.f32 %v2464_v62, %v1309_v48  ;;  %v1316_v31 = vmul.f32 %v2461_v30, %v1309_v48  ;;  %v1317_v32 = vmul.f32 %v2480_v45, %v1309_v48  ;;  %v1318_v35 = vmul.f32 %v2478_v28, %v1309_v48 }
 0x2ba   : >> { %v1284_v48 = vadd.f32 %v1283_v27, %v1282_v56  ;;  %v1292_v56 = vadd.f32 %v1291_v17, %v1290_v36  ;;  %v1365_v27 = vmul.f32 %v2464_v62, %v1359_v12  ;;  %v1361_v36 = vmul.f32 %v2473_v21, %v1354_v39 }
 0x2bb   : >> { %v1319_v41 = vsel %vm1160_vm10, %v1315_v20, 0.0  ;;  %v1327_v29 = vsel %vm1160_vm10, %v1316_v31, 0.0  ;;  %v1335_v43 = vsel %vm1160_vm10, %v1317_v32, 0.0  ;;  %v1343_v57 = vsel %vm1160_vm10, %v1318_v35, 0.0 }
 0x2bc   : >> { %v1320_v13 = vadd.f32 %v1319_v41, %v1311_v40  ;;  %v1328_v24 = vadd.f32 %v1327_v29, %v1312_v37  ;;  %v1336_v59 = vadd.f32 %v1335_v43, %v1313_v47  ;;  %v1344_v14 = vadd.f32 %v1343_v57, %v1314_v33 }
 0x2bd   : >> { %v1299_v20 = vrot.slane %v1298_v18, 1  ;;  %v1276_v40 = vadd.f32 %v1275_v46, %v1274_v23  ;;  %v1260_v37 = vadd.f32 %v1256_v51, %v2426_v50  ;;  %v1259_v47 = vadd.f32 %v1254_v52, %v2430_v42 }
 0x2be   : >> { %v1321_v53 = vrot.slane %v1320_v13, 4  ;;  %v1329_v54 = vrot.slane %v1328_v24, 4  ;;  %v1337_v58 = vrot.slane %v1336_v59, 4  ;;  %v1345_v55 = vrot.slane %v1344_v14, 4 }
 0x2bf   : >> { %v1402_v0 = vsub.f32 %v1258_v16, %v1284_v48  ;;  %v1300_v49 = vadd.f32 %v1299_v20, %v1298_v18  ;;  %v1401_v44 = vsub.f32 %v1257_v15, %v1276_v40  ;;  %v1403_v26 = vsub.f32 %v1259_v47, %v1292_v56 }
 0x2c0   : >> { %v1322_v31 = vadd.f32 %v1321_v53, %v1320_v13  ;;  %v1330_v25 = vadd.f32 %v1329_v54, %v1328_v24  ;;  %v1338_v61 = vadd.f32 %v1337_v58, %v1336_v59  ;;  %v1346_v60 = vadd.f32 %v1345_v55, %v1344_v14 }
 0x2c1   : >> { %v1404_v23 = vsub.f32 %v1260_v37, %v1300_v49  ;;  %v1366_v50 = vmul.f32 %v2461_v30, %v1359_v12  ;;  %v1367_v59 = vmul.f32 %v2480_v45, %v1359_v12  ;;  %v1368_v18 = vmul.f32 %v2478_v28, %v1359_v12 }
 0x2c2   : >> { %v1323_v33 = vrot.slane %v1322_v31, 2  ;;  %v1331_v19 = vrot.slane %v1330_v25, 2  ;;  %v1339_v32 = vrot.slane %v1338_v61, 2  ;;  %v1347_v35 = vrot.slane %v1346_v60, 2 }
 0x2c3   : >> { %v1369_v62 = vsel %vm1160_vm10, %v1365_v27, 0.0  ;;  %v1377_v53 = vsel %vm1160_vm10, %v1366_v50, 0.0  ;;  %v1362_v30 = vmul.f32 %v2468_v34, %v1354_v39  ;;  %v1363_v54 = vmul.f32 %v2489_v63, %v1354_v39 }
 0x2c4   : >> { %v1324_v41 = vadd.f32 %v1323_v33, %v1322_v31  ;;  %v1332_v29 = vadd.f32 %v1331_v19, %v1330_v25  ;;  %v1340_v43 = vadd.f32 %v1339_v32, %v1338_v61  ;;  %v1348_v57 = vadd.f32 %v1347_v35, %v1346_v60 }
 0x2c5   : >> { %v1385_v12 = vsel %vm1160_vm10, %v1367_v59, 0.0  ;;  %v1393_v21 = vsel %vm1160_vm10, %v1368_v18, 0.0  ;;  %v1364_v16 = vmul.f32 %v2484_v38, %v1354_v39  ;;  %v1370_v48 = vadd.f32 %v1369_v62, %v1361_v36 }
 0x2c6   : >> { %v1325_v42 = vrot.slane %v1324_v41, 1  ;;  %v1333_v46 = vrot.slane %v1332_v29, 1  ;;  %v1341_v13 = vrot.slane %v1340_v43, 1  ;;  %v1349_v24 = vrot.slane %v1348_v57, 1 }
 0x2c7   : >> { %v1378_v31 = vadd.f32 %v1377_v53, %v1362_v30  ;;  %v1386_v25 = vadd.f32 %v1385_v12, %v1363_v54  ;;  %v1394_v40 = vadd.f32 %v1393_v21, %v1364_v16  ;;  %v1371_v47 = vrot.slane %v1370_v48, 4 }
 0x2c8   : >> { %v1326_v14 = vadd.f32 %v1325_v42, %v1324_v41  ;;  %v1334_v22 = vadd.f32 %v1333_v46, %v1332_v29  ;;  %v1342_v51 = vadd.f32 %v1341_v13, %v1340_v43  ;;  %v1350_v52 = vadd.f32 %v1349_v24, %v1348_v57 }
 0x2c9   : >> { %v1379_v38 = vrot.slane %v1378_v31, 4  ;;  %v1387_v33 = vrot.slane %v1386_v25, 4  ;;  %v1395_v19 = vrot.slane %v1394_v40, 4  ;;  %v1372_v32 = vadd.f32 %v1371_v47, %v1370_v48 }
 0x2ca   : >> { %v1405_v58 = vmul.f32 %v1401_v44, %v1326_v14  ;;  %v2527_v55 = vmul.f32 %v1402_v0, %v1334_v22  ;;  %v2529_v45 = vmul.f32 %v1403_v26, %v1342_v51  ;;  %v2531_v28 = vmul.f32 %v1404_v23, %v1350_v52 }
 0x2cb   : >> { %v1380_v35 = vadd.f32 %v1379_v38, %v1378_v31  ;;  %v1388_v0 = vadd.f32 %v1387_v33, %v1386_v25  ;;  %v1396_v49 = vadd.f32 %v1395_v19, %v1394_v40  ;;  %v1373_v56 = vrot.slane %v1372_v32, 2 }
 0x2cc   : >> { %v1409_v20 = vsub.f32 0.0, %v1405_v58  ;;  %v1410_v17 = vsub.f32 0.0, %v2527_v55  ;;  %v1411_v34 = vsub.f32 0.0, %v2529_v45  ;;  %v1412_v63 = vsub.f32 0.0, %v2531_v28 }
 0x2cd   : >> { %v1381_v27 = vrot.slane %v1380_v35, 2  ;;  %v1389_v39 = vrot.slane %v1388_v0, 2  ;;  %v1397_v41 = vrot.slane %v1396_v49, 2  ;;  %v1374_v29 = vadd.f32 %v1373_v56, %v1372_v32 }
 0x2ce   : >> { %v1413_v61 = vmul.f32 1.442695, %v1409_v20  ;;  %v1415_v60 = vmul.f32 1.442695, %v1410_v17  ;;  %v1417_v15 = vmul.f32 1.442695, %v1411_v34  ;;  %v1442_v44 = vstv %s1441_s13 }
 0x2cf   : >> { %v1419_v37 = vmul.f32 1.442695, %v1412_v63  ;;  %v1382_v57 = vadd.f32 %v1381_v27, %v1380_v35  ;;  %v1390_v26 = vadd.f32 %v1389_v39, %v1388_v0  ;;  %v1398_v46 = vadd.f32 %v1397_v41, %v1396_v49 }
 0x2d0   : >> { %1802 = vpow2.f32 %v1413_v61  ;;  %v1926_v13 = vmov 1966171168   ;;  %v1375_v62 = vrot.slane %v1374_v29, 1  ;;  %v1443_v36 = vadd.s32 %v1442_v44, %v2074_v7 }
 0x2d1   : >> { %1804 = vpow2.f32 %v1415_v60  ;;  %v1464_v24 = vunpack.c.l.s4 %v1926_v13  ;;  %v1383_v51 = vrot.slane %v1382_v57, 1  ;;  %v1444_v52 = vadd.s32 %v1442_v44, %v2080_v9 }
 0x2d2   : >> { %1806 = vpow2.f32 %v1417_v15  ;;  %v1391_v54 = vrot.slane %v1390_v26, 1  ;;  %v1445_v12 = vadd.s32 %v1442_v44, %v2083_v10  ;;  %v1399_v48 = vrot.slane %v1398_v46, 1 }
 0x2d3   : >> { %1808 = vpow2.f32 %v1419_v37  ;;  %v1446_v20 = vadd.s32 %v1442_v44, %v2086_v11  ;;  %v1376_v63 = vadd.f32 %v1375_v62, %v1374_v29  ;;  %v1465_v31 = vunpack.c.0.s8 %v1464_v24 }
 0x2d4   : >> { %v1384_v60 = vadd.f32 %v1383_v51, %v1382_v57  ;;  %vm1447_vm3 = vcmp.lt.s32.totalorder %v1443_v36, 2500  ;;  %v1392_v37 = vadd.f32 %v1391_v54, %v1390_v26  ;;  %vm1448_vm4 = vcmp.lt.s32.totalorder %v1444_v52, 2500 }
 0x2d5   : >> { %v1400_v38 = vadd.f32 %v1399_v48, %v1398_v46  ;;  %vm1449_vm5 = vcmp.lt.s32.totalorder %v1445_v12, 2500  ;;  %vm1450_vm6 = vcmp.lt.s32.totalorder %v1446_v20, 2500  ;;  %v1468_v19 = vsub.s32 %v1465_v31, %v2071_v6 }
 0x2dd   : >> { %v1803_v43 = vpop.eup %1802 }
 0x2de   : >> { %v1805_v23 = vpop.eup %1804  ;;  %v1421_v50 = vsub.f32 1.0, %v1803_v43  ;;  %v1456_v43 = vld [vmem:[%s1455_s14] sm:$0xf] }
 0x2df   : >> { %v1807_v42 = vpop.eup %1806  ;;  %v1422_v59 = vsub.f32 1.0, %v1805_v23 }
 0x2e0   : >> { %v1809_v18 = vpop.eup %1808  ;;  %v1423_v14 = vsub.f32 1.0, %v1807_v42  ;;  %v1425_v22 = vmax.f32 %v1421_v50, 0.0 }
 0x2e1   : >> { %v1424_v53 = vsub.f32 1.0, %v1809_v18  ;;  %v1426_v30 = vmax.f32 %v1422_v59, 0.0 }
 0x2e2   : >> { %v1427_v21 = vmax.f32 %v1423_v14, 0.0  ;;  %v1429_v16 = vmul.f32 %v1425_v22, %v1405_v58 }
 0x2e3   : >> { %v1428_v17 = vmax.f32 %v1424_v53, 0.0  ;;  %v1430_v34 = vmul.f32 %v1426_v30, %v2527_v55 }
 0x2e4   : >> { %v1431_v25 = vmul.f32 %v1427_v21, %v2529_v45  ;;  %v1433_v61 = vmul.f32 %v1429_v16, %v1425_v22 }
 0x2e5   : >> { %v1432_v15 = vmul.f32 %v1428_v17, %v2531_v28  ;;  %v1434_v40 = vmul.f32 %v1430_v34, %v1426_v30 }
 0x2e6   : >> { %v1435_v47 = vmul.f32 %v1431_v25, %v1427_v21  ;;  %v1437_v58 = vmul.f32 %v1433_v61, %v1376_v63 }
 0x2e7   : >> { %v1436_v33 = vmul.f32 %v1432_v15, %v1428_v17  ;;  %v1438_v55 = vmul.f32 %v1434_v40, %v1384_v60 }
 0x2e8   : >> { %v1439_v45 = vmul.f32 %v1435_v47, %v1392_v37  ;;  %v1451_v32 = vsel %vm1447_vm3, %v1437_v58, 0.0 }
 0x2e9   : >> { %v1440_v35 = vmul.f32 %v1436_v33, %v1400_v38  ;;  %v1452_v0 = vsel %vm1448_vm4, %v1438_v55, 0.0 }
 0x2ea   : >> { %v1453_v49 = vsel %vm1449_vm5, %v1439_v45, 0.0  ;;  %v1461_v28 = vcombine.low %v1451_v32, %v1452_v0 }
 0x2eb   : >> { %v1454_v56 = vsel %vm1450_vm6, %v1440_v35, 0.0 }
 0x2ec   : >> { %v1462_v27 = vcombine.low %v1453_v49, %v1454_v56  ;;  %v1469_v39 = vrot.slane %v1461_v28, %v1468_v19 }
 0x2ee   : >> { %v1476_v41 = vrot.slane %v1462_v27, %v1468_v19 }
 0x2f0   : >> { %v1477_v29 = vcombine.low %v1469_v39, %v1476_v41 }
 0x2f2   : >> { %v1484_v57 = vrot.slane %v1477_v29, %v1468_v19  ;;  %920 = sbr.rel (!%p918_p6) target bundleno = 403 (0x193), region = 117 }
 0x2f4   : >> { %v1486_v44 = vadd.f32 %v1484_v57, %v1456_v43 }
 0x2f6   : >> { %1491 = vst.msk [vmem:[%s1455_s14] sm:$0xf] %vm1489_vm7, %v1486_v44 }
 0x2f7 PF: > { %s1647_s8 = sshll.u32 %s1898_s19, 7  ;;  %s1507_s30 = sshll.u32 %s2041_s6, 4  ;;  %s1508_s30 = int_to_ptr.vmem [resolvable:$true] %s1507_s30 }
 0x2f8   : > { %s1505_s11 = scalar_lea.hbm %s2608_s4, %s1647_s8  ;;  %s2612_s10 = sand.u32 1, %s1886_s16  }
 0x2f9   : > { %s1493_s13 = scalar_lea.sflag [#allocation3], %s2612_s10  ;;  %s1810_s14 = scalar_lea.vmem %s1508_s30, 128 }
 0x2fa   : > { %p1811_p7 = scmp.ne.s32.totalorder %s1508_s30, %s1810_s14  ;;  %s1927_s23 = smov [#allocation2]  }
 0x2fb   : > { %s1814_s9 = sshll.u32 %s1927_s23, 4  ;;  %s1815_s9 = int_to_ptr.vmem [resolvable:$false] %s1814_s9 }
 0x2fc   : > { %p1812_p8 = pnand %p1811_p7, %p2002_p3  ;;  %s1816_s24 = scalar_lea.vmem %s1815_s9, 256 }
 0x2fd   : > { %p1817_p11 = scmp.lt.s32.totalorder %s1508_s30, %s1815_s9  ;;  %p1818_p12 = scmp.lt.s32.totalorder %s1816_s24, %s1810_s14 }
 0x2fe   : > { %p1813_p10 = pneg %p1812_p8 }
 0x2ff   : > { %p1819_p13 = por %p1818_p12, %p1817_p11 }
 0x301   : > { %p1820_p0 = pnand %p1819_p13, %p1813_p10 }
 0x303   : > { %1823 = shalt.err (!%p1820_p0)
}
 0x304   : > { %s1824_s19 = scalar_lea.hbm %s1505_s11, 128  ;;  %s1828_s18 = scalar_lea.hbm %s2608_s4, 256 }
 0x305   : > { %p1825_p1 = scmp.ne.s32.totalorder %s1505_s11, %s1824_s19  ;;  %p1829_p5 = scmp.lt.s32.totalorder %s1505_s11, %s2608_s4 }
 0x306   : > { %p1830_p6 = scmp.lt.s32.totalorder %s1828_s18, %s1824_s19 }
 0x307   : > { %p1826_p2 = pnand %p1825_p1, %p2002_p3 }
 0x308   : > { %p1831_p7 = por %p1830_p6, %p1829_p5 }
 0x309   : > { %p1827_p4 = pneg %p1826_p2 }
 0x30b   : > { %p1832_p8 = pnand %p1831_p7, %p1827_p4 }
 0x30d   : > { %1835 = shalt.err (!%p1832_p8)
}
 0x30e   : > { %1648 = dma.vmem_to_hbm [thread:$0]  (%p2002_p3), %s1508_s30, 128, %s1505_s11, %s1493_s13  }
 0x30f PF: > { %p1654_p10 = scmp.ge.s32.totalorder %s1910_s22, 2  ;;  %s1519_s29 = sand.u32 1, %s1882_s15  }
 0x310   : > { %s1520_s10 = scalar_lea.sflag [#allocation3], %s1519_s29 }
 0x311   : > { %p1651_p11 = pnand %p1654_p10, %p2012_p9 }
 0x313   : > { %p1652_p12 = pneg %p1651_p11 }
 0x315   : > { %1877 = dma.done.wait (%p1652_p12), %s1520_s10, 128  }
 0x316   : > { %1879 = vsyncadd (%p1652_p12), %s1520_s10, 4294967168  ;;  %s17_s22 = sadd.s32 1, %s1910_s22   ;;  %s2613_s15 = smov %s1886_s16 }
 0x317   : > { %p14_p13 = scmp.ge.s32.totalorder %s17_s22, 6   ;;  %s2614_s16 = smov %s1890_s17 }
 0x318   : > { %s2615_s17 = smov %s2020_s5  ;;  %s2616_s18 = smov %s1902_s20 }
 0x319   : > { %s2617_s19 = smov %s1906_s21  ;;  %s2618_s20 = smov %s2621_s25 }
 0x31a   : > { %s2619_s21 = smov %s2625_s26  ;;  %16 = sbr.rel (!%p14_p13) target bundleno = 5 (0x5), region = 128 }
 0x31f   :  { %1525 = vsyncpa [#allocation3], 1 }
 0x320   :  { %1527 = vsyncpa [#allocation3 + $0x1], 1 }

</bundles_post_ra>
